<compile_context>
chip_gen: v7x
topology: tpu7x:2x2x1
jax: 0.10.0
libtpu: 0.0.40
codegen_flags: <defaults>
</compile_context>

<pallas_src>
import functools

import jax
import jax.numpy as jnp
from jax import lax
from jax.experimental import pallas as pl
from jax.experimental.pallas import tpu as pltpu

KH = KW = 3          # 3x3 convs, padding='same'
LANE_PAD = 128       # aligned lane halo around each flattened block


def _bending_conv_kernel(x_ref, w1_ref, b1_ref, w2_ref, b2_ref, mask_ref,
                         o_ref, hid_ref, *, img_w, pad):
    """Fused conv3x3 -> ReLU -> conv3x3 on a lane-dense "padded-flat" layout.

    x_ref   : (C, pad + L + pad) input, spatially pre-padded and flattened on lanes
    w1_ref  : (9, C, C)          conv1 weights, [tap, c_out, c_in], tap = ky*3 + kx
    b1_ref  : (C, 1)             conv1 bias
    w2_ref  : (9, C, C)          conv2 weights
    b2_ref  : (C, 1)             conv2 bias
    mask_ref: (1, L)             1.0 at interior (non-halo) lane positions
    o_ref   : (C, L)             output in the same padded-flat layout
    hid_ref : (C, pad + L + pad) VMEM scratch staging relu(conv1) for conv2's taps
    """
    cc, ll = o_ref.shape
    wp = img_w + 2                       # padded row stride
    shifts = tuple(dy * wp + dx for dy in (-1, 0, 1) for dx in (-1, 0, 1))

    w1 = w1_ref[...]                     # (9, C, C) stays resident in vregs
    w2 = w2_ref[...]

    # ---- conv1: 9 shifted lane-windows of the pre-padded input ----
    acc = jnp.zeros((cc, ll), jnp.float32)
    for t, s in enumerate(shifts):
        win = x_ref[:, pad + s: pad + s + ll]            # (C, L), lane-dense, no reshape
        acc = acc + jnp.dot(w1[t], win, preferred_element_type=jnp.float32)
    # bias + ReLU; zero the halo lanes so conv2's taps see true 'same' padding zeros.
    hid = jnp.maximum(acc + b1_ref[...], 0.0) * mask_ref[...]

    # Stage at a 128-aligned lane offset.  The +/-pad strips of the scratch are never
    # zeroed on purpose: lanes read from there only ever feed halo output positions,
    # which the wrapper discards (interior outputs provably read only [pad, pad+L)).
    hid_ref[:, pad: pad + ll] = hid

    # ---- conv2: same 9 shifted lane-windows, now over relu(conv1) ----
    acc = jnp.zeros((cc, ll), jnp.float32)
    for t, s in enumerate(shifts):
        win = hid_ref[:, pad + s: pad + s + ll]
        acc = acc + jnp.dot(w2[t], win, preferred_element_type=jnp.float32)
    o_ref[...] = (acc + b2_ref[...]).astype(o_ref.dtype)


def _default_batch_block(batch):
    """Whole batch per grid step on single-TC chips (v5e/v6e); one image per step on
    dual-TensorCore v7x so the parallel batch axis spreads over both cores."""
    try:
        kind = jax.devices()[0].device_kind.lower()
    except Exception:
        kind = ""
    if "v7" in kind or "7x" in kind:
        return 1
    return batch


def bending_conv_module(x_nchw, w1_hwio, b1, w2_hwio, b2, *, batch_block=None):
    """Forward pass of BendingConvModule.

    x_nchw : (B, C, H, W) float32   (PyTorch NCHW convention)
    w*_hwio: (3, 3, C, C) float32   conv weights, HWIO
    b*     : (C,)         float32
    returns: (B, C, H, W) float32
    """
    B, C, H, W = x_nchw.shape
    hp, wp = H + 2, W + 2
    pimg = hp * wp                       # flattened padded-image length
    pad = LANE_PAD

    bb = batch_block if batch_block is not None else _default_batch_block(B)
    if bb <= 0 or B % bb != 0:
        bb = 1
    nb = B // bb
    L = bb * pimg

    # ---- host-side layout prep (tiny XLA ops, done once outside the kernel) ----
    # NCHW -> spatially zero-padded, channel-major, flattened on the lane axis.
    xp = jnp.pad(x_nchw.astype(jnp.float32), ((0, 0), (0, 0), (1, 1), (1, 1)))
    xp = xp.reshape(nb, bb, C, pimg).transpose(0, 2, 1, 3)          # (nb, C, bb, Pimg)
    xp = xp.reshape(nb, C, L)
    xp = jnp.pad(xp, ((0, 0), (0, 0), (pad, pad)))                  # aligned lane halo

    # HWIO -> (tap, c_out, c_in), tap = ky*3 + kx (cross-correlation, as torch Conv2d).
    w1p = jnp.transpose(w1_hwio, (0, 1, 3, 2)).reshape(KH * KW, C, C)
    w2p = jnp.transpose(w2_hwio, (0, 1, 3, 2)).reshape(KH * KW, C, C)
    b1c = b1.reshape(C, 1).astype(jnp.float32)
    b2c = b2.reshape(C, 1).astype(jnp.float32)

    # Interior (non-halo) mask in the padded-flat layout; identical for every block.
    r = jnp.arange(pimg, dtype=jnp.int32)
    row, col = r // wp, r % wp
    m_img = ((row >= 1) & (row <= H) & (col >= 1) & (col <= W)).astype(jnp.float32)
    mask = jnp.tile(m_img, bb).reshape(1, L)

    kernel = functools.partial(_bending_conv_kernel, img_w=W, pad=pad)
    out_flat = pl.pallas_call(
        kernel,
        out_shape=jax.ShapeDtypeStruct((nb, C, L), jnp.float32),
        grid=(nb,),
        in_specs=[
            pl.BlockSpec((None, C, L + 2 * pad), lambda i: (i, 0, 0)),
            pl.BlockSpec((KH * KW, C, C), lambda i: (0, 0, 0)),
            pl.BlockSpec((C, 1), lambda i: (0, 0)),
            pl.BlockSpec((KH * KW, C, C), lambda i: (0, 0, 0)),
            pl.BlockSpec((C, 1), lambda i: (0, 0)),
            pl.BlockSpec((1, L), lambda i: (0, 0)),
        ],
        out_specs=pl.BlockSpec((None, C, L), lambda i: (i, 0, 0)),
        scratch_shapes=[pltpu.VMEM((C, L + 2 * pad), jnp.float32)],
        compiler_params=pltpu.CompilerParams(
            dimension_semantics=("parallel",)),
    )(xp, w1p, b1c, w2p, b2c, mask)

    # ---- back to NCHW: drop the 'same'-padding halo, restore batch order ----
    out = out_flat.reshape(nb, C, bb, hp, wp)[:, :, :, 1:1 + H, 1:1 + W]
    return out.transpose(0, 2, 1, 3, 4).reshape(B, C, H, W)


def _reference(x_nchw, w1_hwio, b1, w2_hwio, b2):
    """Pure-JAX reference (cross-correlation, same semantics as torch Conv2d)."""
    dn = lax.conv_dimension_numbers(x_nchw.shape, w1_hwio.shape,
                                    ("NCHW", "HWIO", "NCHW"))
    h = lax.conv_general_dilated(x_nchw, w1_hwio, (1, 1), "SAME",
                                 dimension_numbers=dn)
    h = jnp.maximum(h + b1.reshape(1, -1, 1, 1), 0.0)
    y = lax.conv_general_dilated(h, w2_hwio, (1, 1), "SAME",
                                 dimension_numbers=dn)
    return y + b2.reshape(1, -1, 1, 1)


if __name__ == "__main__":
    B, C, H, W = 2, 4, 16, 16  # n_channels = 4

    key = jax.random.PRNGKey(0)
    kx, kw1, kb1, kw2, kb2 = jax.random.split(key, 5)

    x = jax.random.normal(kx, (B, C, H, W), dtype=jnp.float32)

    # Deterministic parameter init (shapes match nn.Conv2d(C, C, 3)); HWIO layout.
    fan_in = C * KH * KW
    bound = float(fan_in) ** -0.5
    w1 = jax.random.uniform(kw1, (KH, KW, C, C), jnp.float32, -bound, bound)
    b1 = jax.random.uniform(kb1, (C,), jnp.float32, -bound, bound)
    w2 = jax.random.uniform(kw2, (KH, KW, C, C), jnp.float32, -bound, bound)
    b2 = jax.random.uniform(kb2, (C,), jnp.float32, -bound, bound)

    y = bending_conv_module(x, w1, b1, w2, b2)
    y = jax.block_until_ready(y)

    y_ref = _reference(x, w1, b1, w2, b2)
    assert y.shape == (B, C, H, W)
    if not jnp.allclose(y, y_ref, atol=1e-4, rtol=1e-4):
        raise AssertionError("Pallas kernel mismatch vs JAX conv reference")

    print("KERNEL_OK")
</pallas_src>

<mosaic_0001>
module attributes {stable_mosaic.version = 11 : i64} {
  func.func @_bending_conv_kernel(%arg0: i32, %arg1: memref<1x4x904xf32, #tpu.memory_space<vmem>>, %arg2: memref<9x4x4xf32, #tpu.memory_space<vmem>>, %arg3: memref<4x1xf32, #tpu.memory_space<vmem>>, %arg4: memref<9x4x4xf32, #tpu.memory_space<vmem>>, %arg5: memref<4x1xf32, #tpu.memory_space<vmem>>, %arg6: memref<1x648xf32, #tpu.memory_space<vmem>>, %arg7: memref<1x4x648xf32, #tpu.memory_space<vmem>>, %arg8: memref<4x904xf32, #tpu.memory_space<vmem>>) attributes {dimension_semantics = [#tpu.dimension_semantics<parallel>], iteration_bounds = array<i64: 1>, scalar_prefetch = 0 : i64, scratch_operands = 1 : i64, tpu.core_type = #tpu.core_type<tc>, window_params = [{transform_indices = @transform_0, window_bounds = array<i64: 1, 4, 904>}, {pipeline_mode = #tpu.pipeline_mode<synchronous>, transform_indices = @transform_1, window_bounds = array<i64: 9, 4, 4>}, {pipeline_mode = #tpu.pipeline_mode<synchronous>, transform_indices = @transform_2, window_bounds = array<i64: 4, 1>}, {pipeline_mode = #tpu.pipeline_mode<synchronous>, transform_indices = @transform_3, window_bounds = array<i64: 9, 4, 4>}, {pipeline_mode = #tpu.pipeline_mode<synchronous>, transform_indices = @transform_4, window_bounds = array<i64: 4, 1>}, {pipeline_mode = #tpu.pipeline_mode<synchronous>, transform_indices = @transform_5, window_bounds = array<i64: 1, 648>}, {transform_indices = @transform_6, window_bounds = array<i64: 1, 4, 648>}]} {
    %c0 = arith.constant 0 : index
    %c0_0 = arith.constant 0 : index
    %c0_1 = arith.constant 0 : index
    %0 = vector.load %arg2[%c0, %c0_0, %c0_1] : memref<9x4x4xf32, #tpu.memory_space<vmem>>, vector<9x4x4xf32>
    %c0_2 = arith.constant 0 : index
    %c0_3 = arith.constant 0 : index
    %c0_4 = arith.constant 0 : index
    %1 = vector.load %arg4[%c0_2, %c0_3, %c0_4] : memref<9x4x4xf32, #tpu.memory_space<vmem>>, vector<9x4x4xf32>
    %cst = arith.constant 0.000000e+00 : f32
    %2 = vector.broadcast %cst : f32 to vector<4x648xf32>
    %c0_5 = arith.constant 0 : index
    %c0_6 = arith.constant 0 : index
    %c109 = arith.constant 109 : index
    %3 = vector.load %arg1[%c0_5, %c0_6, %c109] : memref<1x4x904xf32, #tpu.memory_space<vmem>>, vector<1x4x648xf32>
    %4 = vector.shape_cast %3 : vector<1x4x648xf32> to vector<4x648xf32>
    %5 = vector.extract_strided_slice %0 {offsets = [0, 0, 0], sizes = [1, 4, 4], strides = [1, 1, 1]} : vector<9x4x4xf32> to vector<1x4x4xf32>
    %6 = vector.shape_cast %5 : vector<1x4x4xf32> to vector<4x4xf32>
    %cst_7 = arith.constant dense<0.000000e+00> : vector<4x648xf32>
    %7 = tpu.matmul %6, %4, %cst_7 {dimension_numbers = #tpu.dot_dimension_numbers<[1], [0], [0], [1], [0, 0, 1, 1], [], []>} : vector<4x4xf32>, vector<4x648xf32>, vector<4x648xf32> -> vector<4x648xf32>
    %8 = arith.addf %2, %7 : vector<4x648xf32>
    %c0_8 = arith.constant 0 : index
    %c0_9 = arith.constant 0 : index
    %c110 = arith.constant 110 : index
    %9 = vector.load %arg1[%c0_8, %c0_9, %c110] : memref<1x4x904xf32, #tpu.memory_space<vmem>>, vector<1x4x648xf32>
    %10 = vector.shape_cast %9 : vector<1x4x648xf32> to vector<4x648xf32>
    %11 = vector.extract_strided_slice %0 {offsets = [1, 0, 0], sizes = [1, 4, 4], strides = [1, 1, 1]} : vector<9x4x4xf32> to vector<1x4x4xf32>
    %12 = vector.shape_cast %11 : vector<1x4x4xf32> to vector<4x4xf32>
    %cst_10 = arith.constant dense<0.000000e+00> : vector<4x648xf32>
    %13 = tpu.matmul %12, %10, %cst_10 {dimension_numbers = #tpu.dot_dimension_numbers<[1], [0], [0], [1], [0, 0, 1, 1], [], []>} : vector<4x4xf32>, vector<4x648xf32>, vector<4x648xf32> -> vector<4x648xf32>
    %14 = arith.addf %8, %13 : vector<4x648xf32>
    %c0_11 = arith.constant 0 : index
    %c0_12 = arith.constant 0 : index
    %c111 = arith.constant 111 : index
    %15 = vector.load %arg1[%c0_11, %c0_12, %c111] : memref<1x4x904xf32, #tpu.memory_space<vmem>>, vector<1x4x648xf32>
    %16 = vector.shape_cast %15 : vector<1x4x648xf32> to vector<4x648xf32>
    %17 = vector.extract_strided_slice %0 {offsets = [2, 0, 0], sizes = [1, 4, 4], strides = [1, 1, 1]} : vector<9x4x4xf32> to vector<1x4x4xf32>
    %18 = vector.shape_cast %17 : vector<1x4x4xf32> to vector<4x4xf32>
    %cst_13 = arith.constant dense<0.000000e+00> : vector<4x648xf32>
    %19 = tpu.matmul %18, %16, %cst_13 {dimension_numbers = #tpu.dot_dimension_numbers<[1], [0], [0], [1], [0, 0, 1, 1], [], []>} : vector<4x4xf32>, vector<4x648xf32>, vector<4x648xf32> -> vector<4x648xf32>
    %20 = arith.addf %14, %19 : vector<4x648xf32>
    %c0_14 = arith.constant 0 : index
    %c0_15 = arith.constant 0 : index
    %c127 = arith.constant 127 : index
    %21 = vector.load %arg1[%c0_14, %c0_15, %c127] : memref<1x4x904xf32, #tpu.memory_space<vmem>>, vector<1x4x648xf32>
    %22 = vector.shape_cast %21 : vector<1x4x648xf32> to vector<4x648xf32>
    %23 = vector.extract_strided_slice %0 {offsets = [3, 0, 0], sizes = [1, 4, 4], strides = [1, 1, 1]} : vector<9x4x4xf32> to vector<1x4x4xf32>
    %24 = vector.shape_cast %23 : vector<1x4x4xf32> to vector<4x4xf32>
    %cst_16 = arith.constant dense<0.000000e+00> : vector<4x648xf32>
    %25 = tpu.matmul %24, %22, %cst_16 {dimension_numbers = #tpu.dot_dimension_numbers<[1], [0], [0], [1], [0, 0, 1, 1], [], []>} : vector<4x4xf32>, vector<4x648xf32>, vector<4x648xf32> -> vector<4x648xf32>
    %26 = arith.addf %20, %25 : vector<4x648xf32>
    %c0_17 = arith.constant 0 : index
    %c0_18 = arith.constant 0 : index
    %c128 = arith.constant 128 : index
    %27 = vector.load %arg1[%c0_17, %c0_18, %c128] : memref<1x4x904xf32, #tpu.memory_space<vmem>>, vector<1x4x648xf32>
    %28 = vector.shape_cast %27 : vector<1x4x648xf32> to vector<4x648xf32>
    %29 = vector.extract_strided_slice %0 {offsets = [4, 0, 0], sizes = [1, 4, 4], strides = [1, 1, 1]} : vector<9x4x4xf32> to vector<1x4x4xf32>
    %30 = vector.shape_cast %29 : vector<1x4x4xf32> to vector<4x4xf32>
    %cst_19 = arith.constant dense<0.000000e+00> : vector<4x648xf32>
    %31 = tpu.matmul %30, %28, %cst_19 {dimension_numbers = #tpu.dot_dimension_numbers<[1], [0], [0], [1], [0, 0, 1, 1], [], []>} : vector<4x4xf32>, vector<4x648xf32>, vector<4x648xf32> -> vector<4x648xf32>
    %32 = arith.addf %26, %31 : vector<4x648xf32>
    %c0_20 = arith.constant 0 : index
    %c0_21 = arith.constant 0 : index
    %c129 = arith.constant 129 : index
    %33 = vector.load %arg1[%c0_20, %c0_21, %c129] : memref<1x4x904xf32, #tpu.memory_space<vmem>>, vector<1x4x648xf32>
    %34 = vector.shape_cast %33 : vector<1x4x648xf32> to vector<4x648xf32>
    %35 = vector.extract_strided_slice %0 {offsets = [5, 0, 0], sizes = [1, 4, 4], strides = [1, 1, 1]} : vector<9x4x4xf32> to vector<1x4x4xf32>
    %36 = vector.shape_cast %35 : vector<1x4x4xf32> to vector<4x4xf32>
    %cst_22 = arith.constant dense<0.000000e+00> : vector<4x648xf32>
    %37 = tpu.matmul %36, %34, %cst_22 {dimension_numbers = #tpu.dot_dimension_numbers<[1], [0], [0], [1], [0, 0, 1, 1], [], []>} : vector<4x4xf32>, vector<4x648xf32>, vector<4x648xf32> -> vector<4x648xf32>
    %38 = arith.addf %32, %37 : vector<4x648xf32>
    %c0_23 = arith.constant 0 : index
    %c0_24 = arith.constant 0 : index
    %c145 = arith.constant 145 : index
    %39 = vector.load %arg1[%c0_23, %c0_24, %c145] : memref<1x4x904xf32, #tpu.memory_space<vmem>>, vector<1x4x648xf32>
    %40 = vector.shape_cast %39 : vector<1x4x648xf32> to vector<4x648xf32>
    %41 = vector.extract_strided_slice %0 {offsets = [6, 0, 0], sizes = [1, 4, 4], strides = [1, 1, 1]} : vector<9x4x4xf32> to vector<1x4x4xf32>
    %42 = vector.shape_cast %41 : vector<1x4x4xf32> to vector<4x4xf32>
    %cst_25 = arith.constant dense<0.000000e+00> : vector<4x648xf32>
    %43 = tpu.matmul %42, %40, %cst_25 {dimension_numbers = #tpu.dot_dimension_numbers<[1], [0], [0], [1], [0, 0, 1, 1], [], []>} : vector<4x4xf32>, vector<4x648xf32>, vector<4x648xf32> -> vector<4x648xf32>
    %44 = arith.addf %38, %43 : vector<4x648xf32>
    %c0_26 = arith.constant 0 : index
    %c0_27 = arith.constant 0 : index
    %c146 = arith.constant 146 : index
    %45 = vector.load %arg1[%c0_26, %c0_27, %c146] : memref<1x4x904xf32, #tpu.memory_space<vmem>>, vector<1x4x648xf32>
    %46 = vector.shape_cast %45 : vector<1x4x648xf32> to vector<4x648xf32>
    %47 = vector.extract_strided_slice %0 {offsets = [7, 0, 0], sizes = [1, 4, 4], strides = [1, 1, 1]} : vector<9x4x4xf32> to vector<1x4x4xf32>
    %48 = vector.shape_cast %47 : vector<1x4x4xf32> to vector<4x4xf32>
    %cst_28 = arith.constant dense<0.000000e+00> : vector<4x648xf32>
    %49 = tpu.matmul %48, %46, %cst_28 {dimension_numbers = #tpu.dot_dimension_numbers<[1], [0], [0], [1], [0, 0, 1, 1], [], []>} : vector<4x4xf32>, vector<4x648xf32>, vector<4x648xf32> -> vector<4x648xf32>
    %50 = arith.addf %44, %49 : vector<4x648xf32>
    %c0_29 = arith.constant 0 : index
    %c0_30 = arith.constant 0 : index
    %c147 = arith.constant 147 : index
    %51 = vector.load %arg1[%c0_29, %c0_30, %c147] : memref<1x4x904xf32, #tpu.memory_space<vmem>>, vector<1x4x648xf32>
    %52 = vector.shape_cast %51 : vector<1x4x648xf32> to vector<4x648xf32>
    %53 = vector.extract_strided_slice %0 {offsets = [8, 0, 0], sizes = [1, 4, 4], strides = [1, 1, 1]} : vector<9x4x4xf32> to vector<1x4x4xf32>
    %54 = vector.shape_cast %53 : vector<1x4x4xf32> to vector<4x4xf32>
    %cst_31 = arith.constant dense<0.000000e+00> : vector<4x648xf32>
    %55 = tpu.matmul %54, %52, %cst_31 {dimension_numbers = #tpu.dot_dimension_numbers<[1], [0], [0], [1], [0, 0, 1, 1], [], []>} : vector<4x4xf32>, vector<4x648xf32>, vector<4x648xf32> -> vector<4x648xf32>
    %56 = arith.addf %50, %55 : vector<4x648xf32>
    %c0_32 = arith.constant 0 : index
    %c0_33 = arith.constant 0 : index
    %57 = vector.load %arg3[%c0_32, %c0_33] : memref<4x1xf32, #tpu.memory_space<vmem>>, vector<4x1xf32>
    %58 = vector.broadcast %57 : vector<4x1xf32> to vector<4x648xf32>
    %59 = arith.addf %56, %58 : vector<4x648xf32>
    %cst_34 = arith.constant 0.000000e+00 : f32
    %60 = vector.broadcast %cst_34 : f32 to vector<4x648xf32>
    %61 = arith.maximumf %59, %60 : vector<4x648xf32>
    %c0_35 = arith.constant 0 : index
    %c0_36 = arith.constant 0 : index
    %62 = vector.load %arg6[%c0_35, %c0_36] : memref<1x648xf32, #tpu.memory_space<vmem>>, vector<1x648xf32>
    %63 = vector.broadcast %62 : vector<1x648xf32> to vector<4x648xf32>
    %64 = arith.mulf %61, %63 : vector<4x648xf32>
    %c0_37 = arith.constant 0 : index
    %c128_38 = arith.constant 128 : index
    %65 = vector.load %arg8[%c0_37, %c128_38] : memref<4x904xf32, #tpu.memory_space<vmem>>, vector<4x648xf32>
    tpu.vector_store %arg8[%c0_37, %c128_38], %64 {strides = array<i32>} : memref<4x904xf32, #tpu.memory_space<vmem>>, vector<4x648xf32>,
    %cst_39 = arith.constant 0.000000e+00 : f32
    %66 = vector.broadcast %cst_39 : f32 to vector<4x648xf32>
    %c0_40 = arith.constant 0 : index
    %c109_41 = arith.constant 109 : index
    %67 = vector.load %arg8[%c0_40, %c109_41] : memref<4x904xf32, #tpu.memory_space<vmem>>, vector<4x648xf32>
    %68 = vector.extract_strided_slice %1 {offsets = [0, 0, 0], sizes = [1, 4, 4], strides = [1, 1, 1]} : vector<9x4x4xf32> to vector<1x4x4xf32>
    %69 = vector.shape_cast %68 : vector<1x4x4xf32> to vector<4x4xf32>
    %cst_42 = arith.constant dense<0.000000e+00> : vector<4x648xf32>
    %70 = tpu.matmul %69, %67, %cst_42 {dimension_numbers = #tpu.dot_dimension_numbers<[1], [0], [0], [1], [0, 0, 1, 1], [], []>} : vector<4x4xf32>, vector<4x648xf32>, vector<4x648xf32> -> vector<4x648xf32>
    %71 = arith.addf %66, %70 : vector<4x648xf32>
    %c0_43 = arith.constant 0 : index
    %c110_44 = arith.constant 110 : index
    %72 = vector.load %arg8[%c0_43, %c110_44] : memref<4x904xf32, #tpu.memory_space<vmem>>, vector<4x648xf32>
    %73 = vector.extract_strided_slice %1 {offsets = [1, 0, 0], sizes = [1, 4, 4], strides = [1, 1, 1]} : vector<9x4x4xf32> to vector<1x4x4xf32>
    %74 = vector.shape_cast %73 : vector<1x4x4xf32> to vector<4x4xf32>
    %cst_45 = arith.constant dense<0.000000e+00> : vector<4x648xf32>
    %75 = tpu.matmul %74, %72, %cst_45 {dimension_numbers = #tpu.dot_dimension_numbers<[1], [0], [0], [1], [0, 0, 1, 1], [], []>} : vector<4x4xf32>, vector<4x648xf32>, vector<4x648xf32> -> vector<4x648xf32>
    %76 = arith.addf %71, %75 : vector<4x648xf32>
    %c0_46 = arith.constant 0 : index
    %c111_47 = arith.constant 111 : index
    %77 = vector.load %arg8[%c0_46, %c111_47] : memref<4x904xf32, #tpu.memory_space<vmem>>, vector<4x648xf32>
    %78 = vector.extract_strided_slice %1 {offsets = [2, 0, 0], sizes = [1, 4, 4], strides = [1, 1, 1]} : vector<9x4x4xf32> to vector<1x4x4xf32>
    %79 = vector.shape_cast %78 : vector<1x4x4xf32> to vector<4x4xf32>
    %cst_48 = arith.constant dense<0.000000e+00> : vector<4x648xf32>
    %80 = tpu.matmul %79, %77, %cst_48 {dimension_numbers = #tpu.dot_dimension_numbers<[1], [0], [0], [1], [0, 0, 1, 1], [], []>} : vector<4x4xf32>, vector<4x648xf32>, vector<4x648xf32> -> vector<4x648xf32>
    %81 = arith.addf %76, %80 : vector<4x648xf32>
    %c0_49 = arith.constant 0 : index
    %c127_50 = arith.constant 127 : index
    %82 = vector.load %arg8[%c0_49, %c127_50] : memref<4x904xf32, #tpu.memory_space<vmem>>, vector<4x648xf32>
    %83 = vector.extract_strided_slice %1 {offsets = [3, 0, 0], sizes = [1, 4, 4], strides = [1, 1, 1]} : vector<9x4x4xf32> to vector<1x4x4xf32>
    %84 = vector.shape_cast %83 : vector<1x4x4xf32> to vector<4x4xf32>
    %cst_51 = arith.constant dense<0.000000e+00> : vector<4x648xf32>
    %85 = tpu.matmul %84, %82, %cst_51 {dimension_numbers = #tpu.dot_dimension_numbers<[1], [0], [0], [1], [0, 0, 1, 1], [], []>} : vector<4x4xf32>, vector<4x648xf32>, vector<4x648xf32> -> vector<4x648xf32>
    %86 = arith.addf %81, %85 : vector<4x648xf32>
    %c0_52 = arith.constant 0 : index
    %c128_53 = arith.constant 128 : index
    %87 = vector.load %arg8[%c0_52, %c128_53] : memref<4x904xf32, #tpu.memory_space<vmem>>, vector<4x648xf32>
    %88 = vector.extract_strided_slice %1 {offsets = [4, 0, 0], sizes = [1, 4, 4], strides = [1, 1, 1]} : vector<9x4x4xf32> to vector<1x4x4xf32>
    %89 = vector.shape_cast %88 : vector<1x4x4xf32> to vector<4x4xf32>
    %cst_54 = arith.constant dense<0.000000e+00> : vector<4x648xf32>
    %90 = tpu.matmul %89, %87, %cst_54 {dimension_numbers = #tpu.dot_dimension_numbers<[1], [0], [0], [1], [0, 0, 1, 1], [], []>} : vector<4x4xf32>, vector<4x648xf32>, vector<4x648xf32> -> vector<4x648xf32>
    %91 = arith.addf %86, %90 : vector<4x648xf32>
    %c0_55 = arith.constant 0 : index
    %c129_56 = arith.constant 129 : index
    %92 = vector.load %arg8[%c0_55, %c129_56] : memref<4x904xf32, #tpu.memory_space<vmem>>, vector<4x648xf32>
    %93 = vector.extract_strided_slice %1 {offsets = [5, 0, 0], sizes = [1, 4, 4], strides = [1, 1, 1]} : vector<9x4x4xf32> to vector<1x4x4xf32>
    %94 = vector.shape_cast %93 : vector<1x4x4xf32> to vector<4x4xf32>
    %cst_57 = arith.constant dense<0.000000e+00> : vector<4x648xf32>
    %95 = tpu.matmul %94, %92, %cst_57 {dimension_numbers = #tpu.dot_dimension_numbers<[1], [0], [0], [1], [0, 0, 1, 1], [], []>} : vector<4x4xf32>, vector<4x648xf32>, vector<4x648xf32> -> vector<4x648xf32>
    %96 = arith.addf %91, %95 : vector<4x648xf32>
    %c0_58 = arith.constant 0 : index
    %c145_59 = arith.constant 145 : index
    %97 = vector.load %arg8[%c0_58, %c145_59] : memref<4x904xf32, #tpu.memory_space<vmem>>, vector<4x648xf32>
    %98 = vector.extract_strided_slice %1 {offsets = [6, 0, 0], sizes = [1, 4, 4], strides = [1, 1, 1]} : vector<9x4x4xf32> to vector<1x4x4xf32>
    %99 = vector.shape_cast %98 : vector<1x4x4xf32> to vector<4x4xf32>
    %cst_60 = arith.constant dense<0.000000e+00> : vector<4x648xf32>
    %100 = tpu.matmul %99, %97, %cst_60 {dimension_numbers = #tpu.dot_dimension_numbers<[1], [0], [0], [1], [0, 0, 1, 1], [], []>} : vector<4x4xf32>, vector<4x648xf32>, vector<4x648xf32> -> vector<4x648xf32>
    %101 = arith.addf %96, %100 : vector<4x648xf32>
    %c0_61 = arith.constant 0 : index
    %c146_62 = arith.constant 146 : index
    %102 = vector.load %arg8[%c0_61, %c146_62] : memref<4x904xf32, #tpu.memory_space<vmem>>, vector<4x648xf32>
    %103 = vector.extract_strided_slice %1 {offsets = [7, 0, 0], sizes = [1, 4, 4], strides = [1, 1, 1]} : vector<9x4x4xf32> to vector<1x4x4xf32>
    %104 = vector.shape_cast %103 : vector<1x4x4xf32> to vector<4x4xf32>
    %cst_63 = arith.constant dense<0.000000e+00> : vector<4x648xf32>
    %105 = tpu.matmul %104, %102, %cst_63 {dimension_numbers = #tpu.dot_dimension_numbers<[1], [0], [0], [1], [0, 0, 1, 1], [], []>} : vector<4x4xf32>, vector<4x648xf32>, vector<4x648xf32> -> vector<4x648xf32>
    %106 = arith.addf %101, %105 : vector<4x648xf32>
    %c0_64 = arith.constant 0 : index
    %c147_65 = arith.constant 147 : index
    %107 = vector.load %arg8[%c0_64, %c147_65] : memref<4x904xf32, #tpu.memory_space<vmem>>, vector<4x648xf32>
    %108 = vector.extract_strided_slice %1 {offsets = [8, 0, 0], sizes = [1, 4, 4], strides = [1, 1, 1]} : vector<9x4x4xf32> to vector<1x4x4xf32>
    %109 = vector.shape_cast %108 : vector<1x4x4xf32> to vector<4x4xf32>
    %cst_66 = arith.constant dense<0.000000e+00> : vector<4x648xf32>
    %110 = tpu.matmul %109, %107, %cst_66 {dimension_numbers = #tpu.dot_dimension_numbers<[1], [0], [0], [1], [0, 0, 1, 1], [], []>} : vector<4x4xf32>, vector<4x648xf32>, vector<4x648xf32> -> vector<4x648xf32>
    %111 = arith.addf %106, %110 : vector<4x648xf32>
    %c0_67 = arith.constant 0 : index
    %c0_68 = arith.constant 0 : index
    %112 = vector.load %arg5[%c0_67, %c0_68] : memref<4x1xf32, #tpu.memory_space<vmem>>, vector<4x1xf32>
    %113 = vector.broadcast %112 : vector<4x1xf32> to vector<4x648xf32>
    %114 = arith.addf %111, %113 : vector<4x648xf32>
    %c0_69 = arith.constant 0 : index
    %c0_70 = arith.constant 0 : index
    %c0_71 = arith.constant 0 : index
    %115 = vector.load %arg7[%c0_69, %c0_70, %c0_71] : memref<1x4x648xf32, #tpu.memory_space<vmem>>, vector<1x4x648xf32>
    %116 = vector.shape_cast %115 : vector<1x4x648xf32> to vector<4x648xf32>
    %117 = vector.shape_cast %114 : vector<4x648xf32> to vector<1x4x648xf32>
    tpu.vector_store %arg7[%c0_69, %c0_70, %c0_71], %117 {strides = array<i32>} : memref<1x4x648xf32, #tpu.memory_space<vmem>>, vector<1x4x648xf32>,
    return
  }
  func.func @transform_0(%arg0: i32) -> (i32, i32, i32) {
    %c0_i32 = arith.constant 0 : i32
    %c0_i32_0 = arith.constant 0 : i32
    %c0_i32_1 = arith.constant 0 : i32
    return %arg0, %c0_i32, %c0_i32_0 : i32, i32, i32
  }
  func.func @transform_1(%arg0: i32) -> (i32, i32, i32) {
    %c0_i32 = arith.constant 0 : i32
    %c0_i32_0 = arith.constant 0 : i32
    %c0_i32_1 = arith.constant 0 : i32
    %c0_i32_2 = arith.constant 0 : i32
    return %c0_i32, %c0_i32_0, %c0_i32_1 : i32, i32, i32
  }
  func.func @transform_2(%arg0: i32) -> (i32, i32) {
    %c0_i32 = arith.constant 0 : i32
    %c0_i32_0 = arith.constant 0 : i32
    %c0_i32_1 = arith.constant 0 : i32
    return %c0_i32, %c0_i32_0 : i32, i32
  }
  func.func @transform_3(%arg0: i32) -> (i32, i32, i32) {
    %c0_i32 = arith.constant 0 : i32
    %c0_i32_0 = arith.constant 0 : i32
    %c0_i32_1 = arith.constant 0 : i32
    %c0_i32_2 = arith.constant 0 : i32
    return %c0_i32, %c0_i32_0, %c0_i32_1 : i32, i32, i32
  }
  func.func @transform_4(%arg0: i32) -> (i32, i32) {
    %c0_i32 = arith.constant 0 : i32
    %c0_i32_0 = arith.constant 0 : i32
    %c0_i32_1 = arith.constant 0 : i32
    return %c0_i32, %c0_i32_0 : i32, i32
  }
  func.func @transform_5(%arg0: i32) -> (i32, i32) {
    %c0_i32 = arith.constant 0 : i32
    %c0_i32_0 = arith.constant 0 : i32
    %c0_i32_1 = arith.constant 0 : i32
    return %c0_i32, %c0_i32_0 : i32, i32
  }
  func.func @transform_6(%arg0: i32) -> (i32, i32, i32) {
    %c0_i32 = arith.constant 0 : i32
    %c0_i32_0 = arith.constant 0 : i32
    %c0_i32_1 = arith.constant 0 : i32
    return %arg0, %c0_i32, %c0_i32_0 : i32, i32, i32
  }
}

</mosaic_0001>

<bundles_post_ra>
// kernel: tpu_custom_call.1
= control target key start
LH: loop header
LB: loop body
LE: loop exit
PB: predicated region body
PF: predicated region fallthrough
CT: control target
= control target key end

     0   :  { %s5087_s25 = smov 18   ;;  %v5088_v5 = vmov 0.0   ;;  %s5728_s0 = inlined_call_operand.vmem [shape: f32[1,4,904], index: 0, kind: input, shape index: {}]   ;;  %s5729_s1 = inlined_call_operand.vmem [shape: f32[9,4,4], index: 1, kind: input, shape index: {}]   ;;  %s5730_s2 = inlined_call_operand.vmem [shape: f32[4,1], index: 2, kind: input, shape index: {}]   ;;  %s5731_s3 = inlined_call_operand.vmem [shape: f32[9,4,4], index: 3, kind: input, shape index: {}]   ;;  %s5732_s4 = inlined_call_operand.vmem [shape: f32[4,1], index: 4, kind: input, shape index: {}]   ;;  %s5733_s5 = inlined_call_operand.vmem [shape: f32[1,648], index: 5, kind: input, shape index: {}]   ;;  %s5734_s6 = inlined_call_operand.hbm [shape: f32[1,4,648], index: 6, kind: output, shape index: {}]  }
   0x1   :  { %v42_v0 = vld [vmem:[%s5728_s0] sm:$0xff]  ;;  %v43_v1 = vld [vmem:[%s5728_s0 + $0x8] sm:$0xff]  ;;  %v44_v4 = vld [vmem:[%s5728_s0 + $0x10] sm:$0xff]  ;;  %150 = vmatprep.mubr.f32.mxu0 %v5088_v5  ;;  %2537 = vmatprep.mubr.f32.mxu1 %v5088_v5 }
   0x2   :  { %51 = vrot.lane.b32.xlu1 %v42_v0, %s5087_s25  ;;  %v48_v2 = vcombine.high %v42_v0, %v42_v0  ;;  %v49_v3 = vcombine.high %v43_v1, %v43_v1 }
   0x4   :  { %53 = vrot.lane.b32.xlu0 %v48_v2, %s5087_s25 }
   0x5   :  { %11 = vsyncpa [#allocation4], 0  ;;  %v50_v6 = vcombine.high %v44_v4, %v44_v4  ;;  %s5089_s28 = smov 19   ;;  %s5090_s29 = smov 17   ;;  %v5168_v7 = vld [vmem:[%s5728_s0 + $0x4] sm:$0xff]  ;;  %v5186_v10 = vld [vmem:[%s5728_s0 + $0xc] sm:$0xff] }
   0x6   :  { %57 = vrot.lane.b32.xlu1 %v49_v3, %s5087_s25  ;;  %s5091_s30 = smov 1   ;;  %v5174_v8 = vcombine.high %v5168_v7, %v5168_v7  ;;  %v809_v9 = vld [vmem:[%s5728_s0 + $0x18] sm:$0xf]  ;;  %s5092_s11 = smov 127   ;;  %v5197_v12 = vcombine.high %v5186_v10, %v5186_v10  ;;  %v2359_v14 = vld [vmem:[%s5730_s2] sm:$0xf] }
   0x7   :  { %v5193_v11 = vld [vmem:[%s5728_s0 + $0x14] sm:$0xff]  ;;  %s5093_s16 = smov 111   ;;  %s5094_s0 = smov 110   ;;  %v5096_v15 = vmov 0   ;;  %vm63_vm0 = vcmask 146432   ;;  %vm73_vm1 = vcmask 1043456  }
   0x8   :  { %55 = vrot.lane.b32.xlu0 %v43_v1, %s5087_s25  ;;  %v5205_v13 = vcombine.high %v5193_v11, %v5193_v11  ;;  %s5095_s17 = smov 109   ;;  %5049 = vset.pattern.permute.xlu1 %v5096_v15  ;;  %v25_v21 = vld [vmem:[%s5729_s1 + $0x4] sm:$0xf]  ;;  %vm69_vm2 = vcmask 31744   ;;  %vm311_vm3 = vcmask 154624   ;;  %vm566_vm4 = vcmask 138240  }
   0x9   :  { %5050 = vset.pattern.permute.xlu0 %v5096_v15  ;;  %v24_v34 = vld [vmem:[%s5729_s1] sm:$0xf]  ;;  %v26_v46 = vld [vmem:[%s5729_s1 + $0x8] sm:$0xf]  ;;  %vm831_vm5 = vcmask 7168   ;;  %vm1336_vm6 = vcmask 1039360  }
   0xa   :  { %61 = vrot.lane.b32.xlu1 %v50_v6, %s5087_s25  ;;  %v27_v58 = vld [vmem:[%s5729_s1 + $0xc] sm:$0xf]  ;;  %vm1597_vm7 = vcmask 908288   ;;  %vm1858_vm8 = vcmask 900096   ;;  %vm2119_vm9 = vcmask 891904   ;;  %vm2429_vm10 = vcmask 64516  }
   0xb   :  { %vm5441_vm11 = vmor %vm2429_vm10, %vm73_vm1 }
   0xc   :  { %59 = vrot.lane.b32.xlu0 %v44_v4, %s5087_s25 }
   0xe   :  { %303 = vrot.lane.b32.xlu1 %v43_v1, %s5089_s28 }
  0x10   :  { %301 = vrot.lane.b32.xlu0 %v48_v2, %s5089_s28 }
  0x12   :  { %305 = vrot.lane.b32.xlu1 %v49_v3, %s5089_s28 }
  0x14   :  { %299 = vrot.lane.b32.xlu0 %v42_v0, %s5089_s28 }
  0x16   :  { %309 = vrot.lane.b32.xlu1 %v50_v6, %s5089_s28 }
  0x18   :  { %307 = vrot.lane.b32.xlu0 %v44_v4, %s5089_s28 }
  0x1a   :  { %558 = vrot.lane.b32.xlu1 %v43_v1, %s5090_s29 }
  0x1c   :  { %556 = vrot.lane.b32.xlu0 %v48_v2, %s5090_s29 }
  0x1e   :  { %560 = vrot.lane.b32.xlu1 %v49_v3, %s5090_s29 }
  0x20   :  { %554 = vrot.lane.b32.xlu0 %v42_v0, %s5090_s29 }
  0x22   :  { %564 = vrot.lane.b32.xlu1 %v50_v6, %s5090_s29 }
  0x24   :  { %562 = vrot.lane.b32.xlu0 %v44_v4, %s5090_s29 }
  0x26   :  { %821 = vrot.lane.b32.xlu1 %v43_v1, %s5091_s30 }
  0x28   :  { %819 = vrot.lane.b32.xlu0 %v48_v2, %s5091_s30 }
  0x2a   :  { %823 = vrot.lane.b32.xlu1 %v49_v3, %s5091_s30 }
  0x2c   :  { %817 = vrot.lane.b32.xlu0 %v42_v0, %s5091_s30 }
  0x2e   :  { %827 = vrot.lane.b32.xlu1 %v50_v6, %s5091_s30  ;;  %v28_v6 = vld [vmem:[%s5729_s1 + $0x10] sm:$0xf] }
  0x30   :  { %825 = vrot.lane.b32.xlu0 %v44_v4, %s5091_s30 }
  0x32   :  { %1326 = vrot.lane.b32.xlu1 %v5174_v8, %s5092_s11 }
  0x34   :  { %829 = vrot.lane.b32.xlu0 %v809_v9, %s5091_s30 }
  0x36   :  { %1324 = vrot.lane.b32.xlu1 %v5168_v7, %s5092_s11 }
  0x38   :  { %1328 = vrot.lane.b32.xlu0 %v5186_v10, %s5092_s11 }
  0x3a   :  { %1332 = vrot.lane.b32.xlu1 %v5193_v11, %s5092_s11 }
  0x3c   :  { %1330 = vrot.lane.b32.xlu0 %v5197_v12, %s5092_s11 }
  0x3e   :  { %1587 = vrot.lane.b32.xlu1 %v5174_v8, %s5093_s16 }
  0x40   :  { %1334 = vrot.lane.b32.xlu0 %v5205_v13, %s5092_s11 }
  0x42   :  { %1585 = vrot.lane.b32.xlu1 %v5168_v7, %s5093_s16 }
  0x44   :  { %1589 = vrot.lane.b32.xlu0 %v5186_v10, %s5093_s16 }
  0x46   :  { %1593 = vrot.lane.b32.xlu1 %v5193_v11, %s5093_s16 }
  0x48   :  { %1591 = vrot.lane.b32.xlu0 %v5197_v12, %s5093_s16 }
  0x4a   :  { %1848 = vrot.lane.b32.xlu1 %v5174_v8, %s5094_s0 }
  0x4c   :  { %1595 = vrot.lane.b32.xlu0 %v5205_v13, %s5093_s16 }
  0x4e   :  { %1846 = vrot.lane.b32.xlu1 %v5168_v7, %s5094_s0 }
  0x50   :  { %1850 = vrot.lane.b32.xlu0 %v5186_v10, %s5094_s0 }
  0x52   :  { %1854 = vrot.lane.b32.xlu1 %v5193_v11, %s5094_s0 }
  0x54   :  { %1852 = vrot.lane.b32.xlu0 %v5197_v12, %s5094_s0 }
  0x56   :  { %2109 = vrot.lane.b32.xlu1 %v5174_v8, %s5095_s17 }
  0x58   :  { %1856 = vrot.lane.b32.xlu0 %v5205_v13, %s5094_s0 }
  0x5a   :  { %2107 = vrot.lane.b32.xlu1 %v5168_v7, %s5095_s17 }
  0x5c   :  { %2111 = vrot.lane.b32.xlu0 %v5186_v10, %s5095_s17 }
  0x5e   :  { %2115 = vrot.lane.b32.xlu1 %v5193_v11, %s5095_s17 }
  0x60   :  { %2113 = vrot.lane.b32.xlu0 %v5197_v12, %s5095_s17 }
  0x62   :  { %2362 = vperm.xlu1 %5049, %v2359_v14  }
  0x64   :  { %2117 = vrot.lane.b32.xlu0 %v5205_v13, %s5095_s17 }
  0x74   :  { %v52_v16 = vpop.permute.xlu1 %51 }
  0x76   :  { %v54_v17 = vpop.permute.xlu0 %53 }
  0x77   :  { %v64_v22 = vsel %vm63_vm0, %v52_v16, %v54_v17 }
  0x78   :  { %v58_v18 = vpop.permute.xlu1 %57 }
  0x7a   :  { %v56_v19 = vpop.permute.xlu0 %55 }
  0x7b   :  { %v65_v20 = vsel %vm63_vm0, %v54_v17, %v56_v19  ;;  %v66_v26 = vsel %vm63_vm0, %v56_v19, %v58_v18 }
  0x7c   :  { %4780 = vmatprep.subr.msk.mxu0 %vm73_vm1, %v65_v20  ;;  %v62_v23 = vpop.permute.xlu1 %61 }
  0x7d   :  { %4781 = vmatpush1.msk.msra.mxu0 %vm73_vm1, %v64_v22 }
  0x7e   :  { %v60_v24 = vpop.permute.xlu0 %59  ;;  %4782 = vmatmul.mubr.msk.f32.vlgmr.msra.gmra.mrb[0].mxu0 %vm69_vm2, %v25_v21 }
  0x7f   :  { %v67_v25 = vsel %vm63_vm0, %v58_v18, %v60_v24  ;;  %221 = vmatprep.mubr.f32.mxu0 %v5088_v5  ;;  %v68_v28 = vsel %vm63_vm0, %v60_v24, %v62_v23 }
  0x80   :  { %4783 = vmatprep.subr.msk.mxu0 %vm73_vm1, %v67_v25  ;;  %v304_v27 = vpop.permute.xlu1 %303 }
  0x81   :  { %4784 = vmatpush1.msk.msra.mxu0 %vm73_vm1, %v66_v26 }
  0x82   :  { %v302_v29 = vpop.permute.xlu0 %301  ;;  %4785 = vmatmul.mubr.msk.f32.vlgmr.msra.gmra.mrb[2].mxu0 %vm69_vm2, %v25_v21  ;;  %4786 = vmatprep.subr.msk.mxu0 %vm73_vm1, %v62_v23 }
  0x83   :  { %v313_v30 = vsel %vm311_vm3, %v302_v29, %v304_v27  ;;  %4787 = vmatpush1.msk.msra.mxu0 %vm73_vm1, %v68_v28  ;;  %292 = vmatprep.mubr.f32.mxu0 %v5088_v5  ;;  %v30_v28 = vld [vmem:[%s5729_s1 + $0x18] sm:$0xf] }
  0x84   :  { %4789 = vmatprep.subr.msk.mxu0 %vm73_vm1, %v313_v30  ;;  %v306_v31 = vpop.permute.xlu1 %305 }
  0x85   :  { %v314_v38 = vsel %vm311_vm3, %v304_v27, %v306_v31 }
  0x86   :  { %v300_v32 = vpop.permute.xlu0 %299  ;;  %4788 = vmatmul.mubr.msk.f32.vlgmr.msra.gmra.mrb[4].mxu0 %vm69_vm2, %v25_v21 }
  0x87   :  { %v312_v33 = vsel %vm311_vm3, %v300_v32, %v302_v29  ;;  %396 = vmatprep.mubr.f32.mxu0 %v5088_v5 }
  0x88   :  { %4790 = vmatpush1.msk.msra.mxu0 %vm73_vm1, %v312_v33  ;;  %v310_v35 = vpop.permute.xlu1 %309 }
  0x8a   :  { %v308_v36 = vpop.permute.xlu0 %307  ;;  %4791 = vmatmul.mubr.msk.f32.vlgmr.msra.gmra.mrb[0].mxu0 %vm69_vm2, %v24_v34 }
  0x8b   :  { %v315_v37 = vsel %vm311_vm3, %v306_v31, %v308_v36  ;;  %467 = vmatprep.mubr.f32.mxu0 %v5088_v5  ;;  %v316_v40 = vsel %vm311_vm3, %v308_v36, %v310_v35 }
  0x8c   :  { %4792 = vmatprep.subr.msk.mxu0 %vm73_vm1, %v315_v37  ;;  %v559_v39 = vpop.permute.xlu1 %558 }
  0x8d   :  { %4793 = vmatpush1.msk.msra.mxu0 %vm73_vm1, %v314_v38  ;;  %v31_v38 = vld [vmem:[%s5729_s1 + $0x1c] sm:$0xf] }
  0x8e   :  { %v557_v41 = vpop.permute.xlu0 %556  ;;  %4794 = vmatmul.mubr.msk.f32.vlgmr.msra.gmra.mrb[2].mxu0 %vm69_vm2, %v24_v34  ;;  %4795 = vmatprep.subr.msk.mxu0 %vm73_vm1, %v310_v35 }
  0x8f   :  { %v568_v42 = vsel %vm566_vm4, %v557_v41, %v559_v39  ;;  %4796 = vmatpush1.msk.msra.mxu0 %vm73_vm1, %v316_v40  ;;  %538 = vmatprep.mubr.f32.mxu0 %v5088_v5 }
  0x90   :  { %4798 = vmatprep.subr.msk.mxu0 %vm73_vm1, %v568_v42  ;;  %v561_v43 = vpop.permute.xlu1 %560 }
  0x91   :  { %v569_v50 = vsel %vm566_vm4, %v559_v39, %v561_v43 }
  0x92   :  { %v555_v44 = vpop.permute.xlu0 %554  ;;  %4797 = vmatmul.mubr.msk.f32.vlgmr.msra.gmra.mrb[4].mxu0 %vm69_vm2, %v24_v34 }
  0x93   :  { %v567_v45 = vsel %vm566_vm4, %v555_v44, %v557_v41  ;;  %651 = vmatprep.mubr.f32.mxu0 %v5088_v5 }
  0x94   :  { %4799 = vmatpush1.msk.msra.mxu0 %vm73_vm1, %v567_v45  ;;  %v565_v47 = vpop.permute.xlu1 %564 }
  0x96   :  { %v563_v48 = vpop.permute.xlu0 %562  ;;  %4800 = vmatmul.mubr.msk.f32.vlgmr.msra.gmra.mrb[0].mxu0 %vm69_vm2, %v26_v46 }
  0x97   :  { %v570_v49 = vsel %vm566_vm4, %v561_v43, %v563_v48  ;;  %722 = vmatprep.mubr.f32.mxu0 %v5088_v5  ;;  %v571_v52 = vsel %vm566_vm4, %v563_v48, %v565_v47  ;;  %v32_v48 = vld [vmem:[%s5729_s1 + $0x20] sm:$0xf] }
  0x98   :  { %4801 = vmatprep.subr.msk.mxu0 %vm73_vm1, %v570_v49  ;;  %v822_v51 = vpop.permute.xlu1 %821 }
  0x99   :  { %4802 = vmatpush1.msk.msra.mxu0 %vm73_vm1, %v569_v50 }
  0x9a   :  { %v820_v53 = vpop.permute.xlu0 %819  ;;  %4803 = vmatmul.mubr.msk.f32.vlgmr.msra.gmra.mrb[2].mxu0 %vm69_vm2, %v26_v46  ;;  %4804 = vmatprep.subr.msk.mxu0 %vm73_vm1, %v565_v47 }
  0x9b   :  { %v833_v54 = vsel %vm831_vm5, %v820_v53, %v822_v51  ;;  %4805 = vmatpush1.msk.msra.mxu0 %vm73_vm1, %v571_v52  ;;  %793 = vmatprep.mubr.f32.mxu0 %v5088_v5  ;;  %v2379_v52 = vlaneseq }
  0x9c   :  { %4807 = vmatprep.subr.msk.mxu0 %vm73_vm1, %v833_v54  ;;  %v824_v55 = vpop.permute.xlu1 %823 }
  0x9d   :  { %v834_v62 = vsel %vm831_vm5, %v822_v51, %v824_v55 }
  0x9e   :  { %v818_v56 = vpop.permute.xlu0 %817  ;;  %4806 = vmatmul.mubr.msk.f32.vlgmr.msra.gmra.mrb[4].mxu0 %vm69_vm2, %v26_v46 }
  0x9f   :  { %v832_v57 = vsel %vm831_vm5, %v818_v56, %v820_v53  ;;  %917 = vmatprep.mubr.f32.mxu0 %v5088_v5  ;;  %v2380_v53 = vshrl.u32 %v2379_v52, 7  ;;  %v2377_v56 = vld [vmem:[%s5733_s5] sm:$0x3f] }
  0xa0   :  { %4808 = vmatpush1.msk.msra.mxu0 %vm73_vm1, %v832_v57  ;;  %v828_v59 = vpop.permute.xlu1 %827 }
  0xa1   :  { %v2381_v54 = vsub.s32 0, %v2380_v53  ;;  %v2385_v57 = vsub.s32 1, %v2380_v53 }
  0xa2   :  { %v826_v60 = vpop.permute.xlu0 %825  ;;  %4809 = vmatmul.mubr.msk.f32.vlgmr.msra.gmra.mrb[0].mxu0 %vm69_vm2, %v27_v58 }
  0xa3   :  { %v835_v61 = vsel %vm831_vm5, %v824_v55, %v826_v60  ;;  %988 = vmatprep.mubr.f32.mxu0 %v5088_v5  ;;  %v836_v2 = vsel %vm831_vm5, %v826_v60, %v828_v59  ;;  %v2382_v60 = vrot.slane %v2377_v56, %v2381_v54 }
  0xa4   :  { %4810 = vmatprep.subr.msk.mxu0 %vm73_vm1, %v835_v61  ;;  %v1327_v63 = vpop.permute.xlu1 %1326 }
  0xa5   :  { %4811 = vmatpush1.msk.msra.mxu0 %vm73_vm1, %v834_v62  ;;  %v2389_v62 = vsub.s32 2, %v2380_v53 }
  0xa6   :  { %v830_v0 = vpop.permute.xlu0 %829  ;;  %4812 = vmatmul.mubr.msk.f32.vlgmr.msra.gmra.mrb[2].mxu0 %vm69_vm2, %v27_v58 }
  0xa7   :  { %v837_v1 = vsel %vm831_vm5, %v828_v59, %v830_v0  ;;  %1059 = vmatprep.mubr.f32.mxu0 %v5088_v5  ;;  %v2386_v0 = vrot.slane %v2377_v56, %v2385_v57 }
  0xa8   :  { %4813 = vmatprep.subr.msk.mxu0 %vm73_vm1, %v837_v1  ;;  %v1325_v3 = vpop.permute.xlu1 %1324  ;;  %v2393_v1 = vsub.s32 3, %v2380_v53 }
  0xa9   :  { %4814 = vmatpush1.msk.msra.mxu0 %vm73_vm1, %v836_v2  ;;  %v1337_v16 = vsel %vm1336_vm6, %v1325_v3, %v1327_v63 }
  0xaa   :  { %4815 = vmatmul.mubr.msk.f32.vlgmr.msra.gmra.mrb[4].mxu0 %vm69_vm2, %v27_v58  ;;  %4816 = vmatprep.subr.msk.mxu0 %vm73_vm1, %v5174_v8  ;;  %v1329_v4 = vpop.permute.xlu0 %1328 }
  0xab   :  { %4817 = vmatpush1.msk.msra.mxu0 %vm73_vm1, %v5168_v7  ;;  %1160 = vmatprep.mubr.f32.mxu0 %v5088_v5  ;;  %v1338_v8 = vsel %vm1336_vm6, %v1327_v63, %v1329_v4 }
  0xac   :  { %4819 = vmatprep.subr.msk.mxu0 %vm73_vm1, %v5197_v12  ;;  %v1333_v9 = vpop.permute.xlu1 %1332 }
  0xae   :  { %4818 = vmatmul.mubr.msk.f32.vlgmr.msra.gmra.mrb[0].mxu0 %vm69_vm2, %v28_v6  ;;  %v1331_v14 = vpop.permute.xlu0 %1330 }
  0xaf   :  { %4820 = vmatpush1.msk.msra.mxu0 %vm73_vm1, %v5186_v10  ;;  %1231 = vmatprep.mubr.f32.mxu0 %v5088_v5  ;;  %v1340_v10 = vsel %vm1336_vm6, %v1331_v14, %v1333_v9  ;;  %v1339_v18 = vsel %vm1336_vm6, %v1329_v4, %v1331_v14  ;;  %v2390_v14 = vrot.slane %v2377_v56, %v2389_v62  ;;  %v33_v62 = vld [vmem:[%s5731_s3] sm:$0xf] }
  0xb0   :  { %4822 = vmatprep.subr.msk.mxu0 %vm73_vm1, %v5205_v13  ;;  %v1588_v7 = vpop.permute.xlu1 %1587 }
  0xb2   :  { %4821 = vmatmul.mubr.msk.f32.vlgmr.msra.gmra.mrb[2].mxu0 %vm69_vm2, %v28_v6  ;;  %v1335_v15 = vpop.permute.xlu0 %1334 }
  0xb3   :  { %4823 = vmatpush1.msk.msra.mxu0 %vm73_vm1, %v5193_v11  ;;  %1302 = vmatprep.mubr.f32.mxu0 %v5088_v5  ;;  %v29_v11 = vld [vmem:[%s5729_s1 + $0x14] sm:$0xf]  ;;  %v1341_v22 = vsel %vm1336_vm6, %v1333_v9, %v1335_v15 }
  0xb4   :  { %4825 = vmatprep.subr.msk.mxu0 %vm73_vm1, %v1338_v8  ;;  %v1586_v12 = vpop.permute.xlu1 %1585  ;;  %v2397_v8 = vsub.s32 4, %v2380_v53 }
  0xb5   :  { %v1598_v26 = vsel %vm1597_vm7, %v1586_v12, %v1588_v7 }
  0xb6   :  { %4824 = vmatmul.mubr.msk.f32.vlgmr.msra.gmra.mrb[4].mxu0 %vm69_vm2, %v28_v6  ;;  %v1590_v13 = vpop.permute.xlu0 %1589 }
  0xb7   :  { %4826 = vmatpush1.msk.msra.mxu0 %vm73_vm1, %v1337_v16  ;;  %1421 = vmatprep.mubr.f32.mxu0 %v5088_v5  ;;  %v1599_v21 = vsel %vm1597_vm7, %v1588_v7, %v1590_v13  ;;  %v2401_v16 = vsub.s32 5, %v2380_v53 }
  0xb8   :  { %4828 = vmatprep.subr.msk.mxu0 %vm73_vm1, %v1340_v10  ;;  %v1594_v17 = vpop.permute.xlu1 %1593  ;;  %v2394_v10 = vrot.slane %v2377_v56, %v2393_v1 }
  0xba   :  { %4827 = vmatmul.mubr.msk.f32.vlgmr.msra.gmra.mrb[0].mxu0 %vm69_vm2, %v29_v11  ;;  %v1592_v19 = vpop.permute.xlu0 %1591 }
  0xbb   :  { %4829 = vmatpush1.msk.msra.mxu0 %vm73_vm1, %v1339_v18  ;;  %1492 = vmatprep.mubr.f32.mxu0 %v5088_v5  ;;  %v1601_v25 = vsel %vm1597_vm7, %v1592_v19, %v1594_v17  ;;  %v1600_v30 = vsel %vm1597_vm7, %v1590_v13, %v1592_v19 }
  0xbc   :  { %4831 = vmatprep.subr.msk.mxu0 %vm73_vm1, %v1335_v15  ;;  %v1849_v20 = vpop.permute.xlu1 %1848 }
  0xbe   :  { %4830 = vmatmul.mubr.msk.f32.vlgmr.msra.gmra.mrb[2].mxu0 %vm69_vm2, %v29_v11  ;;  %v1596_v23 = vpop.permute.xlu0 %1595 }
  0xbf   :  { %4832 = vmatpush1.msk.msra.mxu0 %vm73_vm1, %v1341_v22  ;;  %1563 = vmatprep.mubr.f32.mxu0 %v5088_v5  ;;  %v1602_v33 = vsel %vm1597_vm7, %v1594_v17, %v1596_v23 }
  0xc0   :  { %4834 = vmatprep.subr.msk.mxu0 %vm73_vm1, %v1599_v21  ;;  %v1847_v24 = vpop.permute.xlu1 %1846  ;;  %v2398_v21 = vrot.slane %v2377_v56, %v2397_v8 }
  0xc1   :  { %v1859_v37 = vsel %vm1858_vm8, %v1847_v24, %v1849_v20 }
  0xc2   :  { %4833 = vmatmul.mubr.msk.f32.vlgmr.msra.gmra.mrb[4].mxu0 %vm69_vm2, %v29_v11  ;;  %v1851_v27 = vpop.permute.xlu0 %1850 }
  0xc3   :  { %4835 = vmatpush1.msk.msra.mxu0 %vm73_vm1, %v1598_v26  ;;  %1682 = vmatprep.mubr.f32.mxu0 %v5088_v5  ;;  %v1860_v32 = vsel %vm1858_vm8, %v1849_v20, %v1851_v27 }
  0xc4   :  { %4837 = vmatprep.subr.msk.mxu0 %vm73_vm1, %v1601_v25  ;;  %v1855_v29 = vpop.permute.xlu1 %1854  ;;  %v2402_v25 = vrot.slane %v2377_v56, %v2401_v16 }
  0xc6   :  { %4836 = vmatmul.mubr.msk.f32.vlgmr.msra.gmra.mrb[0].mxu0 %vm69_vm2, %v30_v28  ;;  %v1853_v31 = vpop.permute.xlu0 %1852 }
  0xc7   :  { %4838 = vmatpush1.msk.msra.mxu0 %vm73_vm1, %v1600_v30  ;;  %1753 = vmatprep.mubr.f32.mxu0 %v5088_v5  ;;  %v1862_v36 = vsel %vm1858_vm8, %v1853_v31, %v1855_v29  ;;  %v1861_v41 = vsel %vm1858_vm8, %v1851_v27, %v1853_v31 }
  0xc8   :  { %4840 = vmatprep.subr.msk.mxu0 %vm73_vm1, %v1596_v23  ;;  %v2110_v34 = vpop.permute.xlu1 %2109 }
  0xca   :  { %4839 = vmatmul.mubr.msk.f32.vlgmr.msra.gmra.mrb[2].mxu0 %vm69_vm2, %v30_v28  ;;  %v1857_v35 = vpop.permute.xlu0 %1856 }
  0xcb   :  { %4841 = vmatpush1.msk.msra.mxu0 %vm73_vm1, %v1602_v33  ;;  %1824 = vmatprep.mubr.f32.mxu0 %v5088_v5  ;;  %v1863_v43 = vsel %vm1858_vm8, %v1855_v29, %v1857_v35 }
  0xcc   :  { %4843 = vmatprep.subr.msk.mxu0 %vm73_vm1, %v1860_v32  ;;  %v2108_v39 = vpop.permute.xlu1 %2107 }
  0xcd   :  { %v2120_v47 = vsel %vm2119_vm9, %v2108_v39, %v2110_v34 }
  0xce   :  { %4842 = vmatmul.mubr.msk.f32.vlgmr.msra.gmra.mrb[4].mxu0 %vm69_vm2, %v30_v28  ;;  %v2112_v40 = vpop.permute.xlu0 %2111 }
  0xcf   :  { %4844 = vmatpush1.msk.msra.mxu0 %vm73_vm1, %v1859_v37  ;;  %1943 = vmatprep.mubr.f32.mxu0 %v5088_v5  ;;  %v2121_v42 = vsel %vm2119_vm9, %v2110_v34, %v2112_v40 }
  0xd0   :  { %4846 = vmatprep.subr.msk.mxu0 %vm73_vm1, %v1862_v36  ;;  %v2116_v45 = vpop.permute.xlu1 %2115 }
  0xd2   :  { %4845 = vmatmul.mubr.msk.f32.vlgmr.msra.gmra.mrb[0].mxu0 %vm69_vm2, %v31_v38  ;;  %v2114_v44 = vpop.permute.xlu0 %2113 }
  0xd3   :  { %4847 = vmatpush1.msk.msra.mxu0 %vm73_vm1, %v1861_v41  ;;  %2014 = vmatprep.mubr.f32.mxu0 %v5088_v5  ;;  %v2123_v46 = vsel %vm2119_vm9, %v2114_v44, %v2116_v45  ;;  %v2122_v49 = vsel %vm2119_vm9, %v2112_v40, %v2114_v44  ;;  %v4739_v44 = vld [vmem:[%s5732_s4] sm:$0xf] }
  0xd4   :  { %4849 = vmatprep.subr.msk.mxu0 %vm73_vm1, %v1857_v35 }
  0xd6   :  { %4848 = vmatmul.mubr.msk.f32.vlgmr.msra.gmra.mrb[2].mxu0 %vm69_vm2, %v31_v38  ;;  %v2118_v50 = vpop.permute.xlu0 %2117 }
  0xd7   :  { %4850 = vmatpush1.msk.msra.mxu0 %vm73_vm1, %v1863_v43  ;;  %2085 = vmatprep.mubr.f32.mxu0 %v5088_v5  ;;  %v2124_v51 = vsel %vm2119_vm9, %v2116_v45, %v2118_v50 }
  0xd8   :  { %4852 = vmatprep.subr.msk.mxu0 %vm73_vm1, %v2121_v42 }
  0xda   :  { %4851 = vmatmul.mubr.msk.f32.vlgmr.msra.gmra.mrb[4].mxu0 %vm69_vm2, %v31_v38 }
  0xdb   :  { %4853 = vmatpush1.msk.msra.mxu0 %vm73_vm1, %v2120_v47  ;;  %2204 = vmatprep.mubr.f32.mxu0 %v5088_v5 }
  0xdc   :  { %4855 = vmatprep.subr.msk.mxu0 %vm73_vm1, %v2123_v46 }
  0xde   :  { %4854 = vmatmul.mubr.msk.f32.vlgmr.msra.gmra.mrb[0].mxu0 %vm69_vm2, %v32_v48 }
  0xdf   :  { %4856 = vmatpush1.msk.msra.mxu0 %vm73_vm1, %v2122_v49  ;;  %2275 = vmatprep.mubr.f32.mxu0 %v5088_v5 }
  0xe0   :  { %4858 = vmatprep.subr.msk.mxu0 %vm73_vm1, %v2118_v50  ;;  %v34_v50 = vld [vmem:[%s5731_s3 + $0x4] sm:$0xf] }
  0xe1   :  { %v2363_v55 = vpop.permute.xlu1 %2362 }
  0xe2   :  { %4857 = vmatmul.mubr.msk.f32.vlgmr.msra.gmra.mrb[2].mxu0 %vm69_vm2, %v32_v48 }
  0xe3   :  { %4859 = vmatpush1.msk.msra.mxu0 %vm73_vm1, %v2124_v51  ;;  %2346 = vmatprep.mubr.f32.mxu0 %v5088_v5 }
  0xe6   :  { %4860 = vmatmul.mubr.msk.f32.vlgmr.msra.gmra.mrb[4].mxu0 %vm69_vm2, %v32_v48 }
 0x1b1   :  { %v2206_v58 = vpop.f32.mrb[0].mxu0 }
 0x1b2   :  { %v2365_v59 = vadd.f32 %v2363_v55, %v2206_v58  ;;  %v2208_v61 = vpop.f32.mrb[1].mxu0 }
 0x1b3   :  { %v2366_v63 = vadd.f32 %v2363_v55, %v2208_v61 }
 0x1b4   :  { %v2371_v2 = vmax.f32 %v2365_v59, 0.0 }
 0x1b5   :  { %v2372_v3 = vmax.f32 %v2366_v63, 0.0  ;;  %v2277_v4 = vpop.f32.mrb[2].mxu0 }
 0x1b6   :  { %v2409_v6 = vmul.f32 %v2382_v60, %v2371_v2  ;;  %v2367_v9 = vadd.f32 %v2363_v55, %v2277_v4  ;;  %v2279_v7 = vpop.f32.mrb[3].mxu0 }
 0x1b7   :  { %v2410_v15 = vmul.f32 %v2386_v0, %v2372_v3  ;;  %v2368_v12 = vadd.f32 %v2363_v55, %v2279_v7 }
 0x1b8   :  { %v2373_v13 = vmax.f32 %v2367_v9, 0.0 }
 0x1b9   :  { %v5434_v11 = vcombine.low %v2409_v6, %v2410_v15  ;;  %v2374_v17 = vmax.f32 %v2368_v12, 0.0  ;;  %v2348_v18 = vpop.f32.mrb[4].mxu0  ;;  %v5472_v40 = vcombine.low %v2410_v15, %v2410_v15  ;;  %v35_v15 = vld [vmem:[%s5731_s3 + $0x8] sm:$0xf] }
 0x1ba   :  { %v2411_v19 = vmul.f32 %v2390_v14, %v2373_v13  ;;  %v2369_v20 = vadd.f32 %v2363_v55, %v2348_v18  ;;  %v2350_v22 = vpop.f32.mrb[5].mxu0 }
 0x1bb   :  { %2427 = vst [vmem:[#allocation2 + $0x4] sm:$0xff] %v5434_v11  ;;  %v2412_v23 = vmul.f32 %v2394_v10, %v2374_v17  ;;  %v2370_v24 = vadd.f32 %v2363_v55, %v2350_v22 }
 0x1bc   :  { %v2375_v26 = vmax.f32 %v2369_v20, 0.0 }
 0x1bd   :  { %v5437_v27 = vcombine.low %v2411_v19, %v2412_v23  ;;  %v2376_v28 = vmax.f32 %v2370_v24, 0.0  ;;  %v5478_v41 = vcombine.low %v2412_v23, %v2412_v23  ;;  %v36_v24 = vld [vmem:[%s5731_s3 + $0xc] sm:$0xf] }
 0x1be   :  { %v2413_v29 = vmul.f32 %v2398_v21, %v2375_v26 }
 0x1bf   :  { %2428 = vst [vmem:[#allocation2 + $0xc] sm:$0xff] %v5437_v27  ;;  %v2414_v30 = vmul.f32 %v2402_v25, %v2376_v28 }
 0x1c1   :  { %v2423_v32 = vcombine.low %v2413_v29, %v2414_v30 }
 0x1c2   :  { %v2432_v33 = vld [vmem:[#allocation2] sm:$0xff] }
 0x1c3   :  { %2431 = vst.msk [vmem:[#allocation2 + $0x14] sm:$0xff] %vm5441_vm11, %v2423_v32  ;;  %2441 = vrot.lane.b32.xlu0 %v2432_v33, %s5087_s25  ;;  %v2438_v34 = vcombine.high %v2432_v33, %v2432_v33 }
 0x1c6   :  { %v2433_v35 = vld [vmem:[#allocation2 + $0x8] sm:$0xff] }
 0x1c7   :  { %2443 = vrot.lane.b32.xlu0 %v2438_v34, %s5087_s25  ;;  %2445 = vrot.lane.b32.xlu1 %v2433_v35, %s5087_s25  ;;  %v2439_v36 = vcombine.high %v2433_v35, %v2433_v35 }
 0x1ca   :  { %v2434_v37 = vld [vmem:[#allocation2 + $0x10] sm:$0xff]  ;;  %v3194_v39 = vld [vmem:[#allocation2 + $0x18] sm:$0xf] }
 0x1cb   :  { %2447 = vrot.lane.b32.xlu1 %v2439_v36, %s5087_s25  ;;  %2449 = vrot.lane.b32.xlu0 %v2434_v37, %s5087_s25  ;;  %v2440_v38 = vcombine.high %v2434_v37, %v2434_v37  ;;  %v5480_v42 = vld [vmem:[#allocation2 + $0x14] sm:$0xff] }
 0x1cc   :  { %v5488_v43 = vcombine.high %v5480_v42, %v5480_v42 }
 0x1cf   :  { %2688 = vrot.lane.b32.xlu0 %v2438_v34, %s5089_s28  ;;  %2451 = vrot.lane.b32.xlu1 %v2440_v38, %s5087_s25 }
 0x1d3   :  { %2686 = vrot.lane.b32.xlu0 %v2432_v33, %s5089_s28  ;;  %2690 = vrot.lane.b32.xlu1 %v2433_v35, %s5089_s28 }
 0x1d7   :  { %2694 = vrot.lane.b32.xlu0 %v2434_v37, %s5089_s28  ;;  %2692 = vrot.lane.b32.xlu1 %v2439_v36, %s5089_s28 }
 0x1db   :  { %2942 = vrot.lane.b32.xlu0 %v2438_v34, %s5090_s29  ;;  %2696 = vrot.lane.b32.xlu1 %v2440_v38, %s5089_s28 }
 0x1df   :  { %2940 = vrot.lane.b32.xlu0 %v2432_v33, %s5090_s29  ;;  %2944 = vrot.lane.b32.xlu1 %v2433_v35, %s5090_s29 }
 0x1e3   :  { %2948 = vrot.lane.b32.xlu0 %v2434_v37, %s5090_s29  ;;  %2946 = vrot.lane.b32.xlu1 %v2439_v36, %s5090_s29 }
 0x1e7   :  { %3204 = vrot.lane.b32.xlu0 %v2438_v34, %s5091_s30  ;;  %2950 = vrot.lane.b32.xlu1 %v2440_v38, %s5090_s29 }
 0x1eb   :  { %3202 = vrot.lane.b32.xlu0 %v2432_v33, %s5091_s30  ;;  %3206 = vrot.lane.b32.xlu1 %v2433_v35, %s5091_s30 }
 0x1ef   :  { %3210 = vrot.lane.b32.xlu0 %v2434_v37, %s5091_s30  ;;  %3208 = vrot.lane.b32.xlu1 %v2439_v36, %s5091_s30  ;;  %v37_v37 = vld [vmem:[%s5731_s3 + $0x10] sm:$0xf] }
 0x1f3   :  { %3214 = vrot.lane.b32.xlu0 %v3194_v39, %s5091_s30  ;;  %3212 = vrot.lane.b32.xlu1 %v2440_v38, %s5091_s30 }
 0x1f7   :  { %3712 = vrot.lane.b32.xlu0 %v5437_v27, %s5092_s11  ;;  %3710 = vrot.lane.b32.xlu1 %v5472_v40, %s5092_s11 }
 0x1fb   :  { %3714 = vrot.lane.b32.xlu0 %v5478_v41, %s5092_s11  ;;  %3708 = vrot.lane.b32.xlu1 %v5434_v11, %s5092_s11 }
 0x1ff   :  { %3718 = vrot.lane.b32.xlu0 %v5488_v43, %s5092_s11  ;;  %3716 = vrot.lane.b32.xlu1 %v5480_v42, %s5092_s11 }
 0x203   :  { %3972 = vrot.lane.b32.xlu0 %v5437_v27, %s5093_s16  ;;  %3970 = vrot.lane.b32.xlu1 %v5472_v40, %s5093_s16 }
 0x207   :  { %3974 = vrot.lane.b32.xlu0 %v5478_v41, %s5093_s16  ;;  %3968 = vrot.lane.b32.xlu1 %v5434_v11, %s5093_s16 }
 0x20b   :  { %3978 = vrot.lane.b32.xlu0 %v5488_v43, %s5093_s16  ;;  %3976 = vrot.lane.b32.xlu1 %v5480_v42, %s5093_s16 }
 0x20f   :  { %4232 = vrot.lane.b32.xlu0 %v5437_v27, %s5094_s0  ;;  %4230 = vrot.lane.b32.xlu1 %v5472_v40, %s5094_s0 }
 0x213   :  { %4234 = vrot.lane.b32.xlu0 %v5478_v41, %s5094_s0  ;;  %4228 = vrot.lane.b32.xlu1 %v5434_v11, %s5094_s0 }
 0x217   :  { %4238 = vrot.lane.b32.xlu0 %v5488_v43, %s5094_s0  ;;  %4236 = vrot.lane.b32.xlu1 %v5480_v42, %s5094_s0 }
 0x21b   :  { %4492 = vrot.lane.b32.xlu0 %v5437_v27, %s5095_s17  ;;  %4490 = vrot.lane.b32.xlu1 %v5472_v40, %s5095_s17 }
 0x21f   :  { %4494 = vrot.lane.b32.xlu0 %v5478_v41, %s5095_s17  ;;  %4488 = vrot.lane.b32.xlu1 %v5434_v11, %s5095_s17 }
 0x223   :  { %4498 = vrot.lane.b32.xlu0 %v5488_v43, %s5095_s17  ;;  %4496 = vrot.lane.b32.xlu1 %v5480_v42, %s5095_s17 }
 0x227   :  { %4742 = vperm.xlu1 %5049, %v4739_v44  }
 0x235   :  { %v2442_v45 = vpop.permute.xlu0 %2441 }
 0x239   :  { %v2444_v46 = vpop.permute.xlu0 %2443  ;;  %v2446_v47 = vpop.permute.xlu1 %2445 }
 0x23a   :  { %v2454_v48 = vsel %vm63_vm0, %v2444_v46, %v2446_v47  ;;  %v2453_v49 = vsel %vm63_vm0, %v2442_v45, %v2444_v46 }
 0x23b   :  { %4861 = vmatprep.subr.msk.mxu1 %vm73_vm1, %v2454_v48 }
 0x23c   :  { %4862 = vmatpush1.msk.msra.mxu1 %vm73_vm1, %v2453_v49 }
 0x23d   :  { %4863 = vmatmul.mubr.msk.f32.vlgmr.msra.gmra.mrb[0].mxu1 %vm69_vm2, %v34_v50  ;;  %v2448_v51 = vpop.permute.xlu1 %2447  ;;  %v2450_v52 = vpop.permute.xlu0 %2449 }
 0x23e   :  { %v2455_v53 = vsel %vm63_vm0, %v2446_v47, %v2448_v51  ;;  %v2456_v54 = vsel %vm63_vm0, %v2448_v51, %v2450_v52  ;;  %2608 = vmatprep.mubr.f32.mxu1 %v5088_v5 }
 0x23f   :  { %4864 = vmatprep.subr.msk.mxu1 %vm73_vm1, %v2456_v54 }
 0x240   :  { %4865 = vmatpush1.msk.msra.mxu1 %vm73_vm1, %v2455_v53 }
 0x241   :  { %4866 = vmatmul.mubr.msk.f32.vlgmr.msra.gmra.mrb[2].mxu1 %vm69_vm2, %v34_v50  ;;  %v2689_v55 = vpop.permute.xlu0 %2688  ;;  %v2452_v56 = vpop.permute.xlu1 %2451 }
 0x242   :  { %v2457_v57 = vsel %vm63_vm0, %v2450_v52, %v2452_v56  ;;  %4867 = vmatprep.subr.msk.mxu1 %vm73_vm1, %v2452_v56  ;;  %2679 = vmatprep.mubr.f32.mxu1 %v5088_v5 }
 0x243   :  { %4868 = vmatpush1.msk.msra.mxu1 %vm73_vm1, %v2457_v57  ;;  %v39_v57 = vld [vmem:[%s5731_s3 + $0x18] sm:$0xf] }
 0x245   :  { %v2687_v58 = vpop.permute.xlu0 %2686  ;;  %4869 = vmatmul.mubr.msk.f32.vlgmr.msra.gmra.mrb[4].mxu1 %vm69_vm2, %v34_v50  ;;  %v2691_v59 = vpop.permute.xlu1 %2690 }
 0x246   :  { %v2698_v60 = vsel %vm311_vm3, %v2687_v58, %v2689_v55  ;;  %v2699_v61 = vsel %vm311_vm3, %v2689_v55, %v2691_v59  ;;  %2782 = vmatprep.mubr.f32.mxu1 %v5088_v5 }
 0x247   :  { %4870 = vmatprep.subr.msk.mxu1 %vm73_vm1, %v2699_v61 }
 0x248   :  { %4871 = vmatpush1.msk.msra.mxu1 %vm73_vm1, %v2698_v60 }
 0x249   :  { %v2695_v63 = vpop.permute.xlu0 %2694  ;;  %4872 = vmatmul.mubr.msk.f32.vlgmr.msra.gmra.mrb[0].mxu1 %vm69_vm2, %v33_v62  ;;  %v2693_v0 = vpop.permute.xlu1 %2692 }
 0x24a   :  { %v2700_v1 = vsel %vm311_vm3, %v2691_v59, %v2693_v0  ;;  %v2701_v2 = vsel %vm311_vm3, %v2693_v0, %v2695_v63  ;;  %2853 = vmatprep.mubr.f32.mxu1 %v5088_v5 }
 0x24b   :  { %4873 = vmatprep.subr.msk.mxu1 %vm73_vm1, %v2701_v2 }
 0x24c   :  { %4874 = vmatpush1.msk.msra.mxu1 %vm73_vm1, %v2700_v1 }
 0x24d   :  { %v2943_v3 = vpop.permute.xlu0 %2942  ;;  %4875 = vmatmul.mubr.msk.f32.vlgmr.msra.gmra.mrb[2].mxu1 %vm69_vm2, %v33_v62  ;;  %v2697_v4 = vpop.permute.xlu1 %2696 }
 0x24e   :  { %v2702_v6 = vsel %vm311_vm3, %v2695_v63, %v2697_v4  ;;  %4876 = vmatprep.subr.msk.mxu1 %vm73_vm1, %v2697_v4  ;;  %2924 = vmatprep.mubr.f32.mxu1 %v5088_v5  ;;  %v40_v4 = vld [vmem:[%s5731_s3 + $0x1c] sm:$0xf] }
 0x24f   :  { %4877 = vmatpush1.msk.msra.mxu1 %vm73_vm1, %v2702_v6 }
 0x251   :  { %v2941_v9 = vpop.permute.xlu0 %2940  ;;  %4878 = vmatmul.mubr.msk.f32.vlgmr.msra.gmra.mrb[4].mxu1 %vm69_vm2, %v33_v62  ;;  %v2945_v14 = vpop.permute.xlu1 %2944 }
 0x252   :  { %v2952_v7 = vsel %vm566_vm4, %v2941_v9, %v2943_v3  ;;  %v2953_v8 = vsel %vm566_vm4, %v2943_v3, %v2945_v14  ;;  %3036 = vmatprep.mubr.f32.mxu1 %v5088_v5 }
 0x253   :  { %4879 = vmatprep.subr.msk.mxu1 %vm73_vm1, %v2953_v8 }
 0x254   :  { %4880 = vmatpush1.msk.msra.mxu1 %vm73_vm1, %v2952_v7 }
 0x255   :  { %v2949_v12 = vpop.permute.xlu0 %2948  ;;  %4881 = vmatmul.mubr.msk.f32.vlgmr.msra.gmra.mrb[0].mxu1 %vm69_vm2, %v35_v15  ;;  %v2947_v10 = vpop.permute.xlu1 %2946 }
 0x256   :  { %v2954_v16 = vsel %vm566_vm4, %v2945_v14, %v2947_v10  ;;  %v2955_v13 = vsel %vm566_vm4, %v2947_v10, %v2949_v12  ;;  %3107 = vmatprep.mubr.f32.mxu1 %v5088_v5 }
 0x257   :  { %4882 = vmatprep.subr.msk.mxu1 %vm73_vm1, %v2955_v13  ;;  %v41_v13 = vld [vmem:[%s5731_s3 + $0x20] sm:$0xf] }
 0x258   :  { %4883 = vmatpush1.msk.msra.mxu1 %vm73_vm1, %v2954_v16 }
 0x259   :  { %v3205_v17 = vpop.permute.xlu0 %3204  ;;  %4884 = vmatmul.mubr.msk.f32.vlgmr.msra.gmra.mrb[2].mxu1 %vm69_vm2, %v35_v15  ;;  %v2951_v18 = vpop.permute.xlu1 %2950 }
 0x25a   :  { %v2956_v19 = vsel %vm566_vm4, %v2949_v12, %v2951_v18  ;;  %4885 = vmatprep.subr.msk.mxu1 %vm73_vm1, %v2951_v18  ;;  %3178 = vmatprep.mubr.f32.mxu1 %v5088_v5 }
 0x25b   :  { %4886 = vmatpush1.msk.msra.mxu1 %vm73_vm1, %v2956_v19 }
 0x25d   :  { %v3203_v20 = vpop.permute.xlu0 %3202  ;;  %4887 = vmatmul.mubr.msk.f32.vlgmr.msra.gmra.mrb[4].mxu1 %vm69_vm2, %v35_v15  ;;  %v3207_v21 = vpop.permute.xlu1 %3206 }
 0x25e   :  { %v3216_v22 = vsel %vm831_vm5, %v3203_v20, %v3205_v17  ;;  %v3217_v23 = vsel %vm831_vm5, %v3205_v17, %v3207_v21  ;;  %3301 = vmatprep.mubr.f32.mxu1 %v5088_v5 }
 0x25f   :  { %4888 = vmatprep.subr.msk.mxu1 %vm73_vm1, %v3217_v23 }
 0x260   :  { %4889 = vmatpush1.msk.msra.mxu1 %vm73_vm1, %v3216_v22 }
 0x261   :  { %v3211_v25 = vpop.permute.xlu0 %3210  ;;  %4890 = vmatmul.mubr.msk.f32.vlgmr.msra.gmra.mrb[0].mxu1 %vm69_vm2, %v36_v24  ;;  %v3209_v26 = vpop.permute.xlu1 %3208 }
 0x262   :  { %v3218_v28 = vsel %vm831_vm5, %v3207_v21, %v3209_v26  ;;  %v3219_v29 = vsel %vm831_vm5, %v3209_v26, %v3211_v25  ;;  %3372 = vmatprep.mubr.f32.mxu1 %v5088_v5 }
 0x263   :  { %4891 = vmatprep.subr.msk.mxu1 %vm73_vm1, %v3219_v29 }
 0x264   :  { %4892 = vmatpush1.msk.msra.mxu1 %vm73_vm1, %v3218_v28 }
 0x265   :  { %v3215_v30 = vpop.permute.xlu0 %3214  ;;  %4893 = vmatmul.mubr.msk.f32.vlgmr.msra.gmra.mrb[2].mxu1 %vm69_vm2, %v36_v24  ;;  %v3213_v32 = vpop.permute.xlu1 %3212 }
 0x266   :  { %v3220_v33 = vsel %vm831_vm5, %v3211_v25, %v3213_v32  ;;  %v3221_v34 = vsel %vm831_vm5, %v3213_v32, %v3215_v30  ;;  %3443 = vmatprep.mubr.f32.mxu1 %v5088_v5 }
 0x267   :  { %4894 = vmatprep.subr.msk.mxu1 %vm73_vm1, %v3221_v34 }
 0x268   :  { %4895 = vmatpush1.msk.msra.mxu1 %vm73_vm1, %v3220_v33 }
 0x269   :  { %v3713_v35 = vpop.permute.xlu0 %3712  ;;  %4896 = vmatmul.mubr.msk.f32.vlgmr.msra.gmra.mrb[4].mxu1 %vm69_vm2, %v36_v24  ;;  %4897 = vmatprep.subr.msk.mxu1 %vm73_vm1, %v5472_v40  ;;  %v3711_v36 = vpop.permute.xlu1 %3710 }
 0x26a   :  { %4898 = vmatpush1.msk.msra.mxu1 %vm73_vm1, %v5434_v11  ;;  %3544 = vmatprep.mubr.f32.mxu1 %v5088_v5  ;;  %v3721_v44 = vsel %vm1336_vm6, %v3711_v36, %v3713_v35 }
 0x26b   :  { %4900 = vmatprep.subr.msk.mxu1 %vm73_vm1, %v5478_v41 }
 0x26d   :  { %v3715_v38 = vpop.permute.xlu0 %3714  ;;  %4899 = vmatmul.mubr.msk.f32.vlgmr.msra.gmra.mrb[0].mxu1 %vm69_vm2, %v37_v37  ;;  %v3709_v39 = vpop.permute.xlu1 %3708 }
 0x26e   :  { %4901 = vmatpush1.msk.msra.mxu1 %vm73_vm1, %v5437_v27  ;;  %3615 = vmatprep.mubr.f32.mxu1 %v5088_v5  ;;  %v3720_v27 = vsel %vm1336_vm6, %v3709_v39, %v3711_v36  ;;  %v3722_v46 = vsel %vm1336_vm6, %v3713_v35, %v3715_v38 }
 0x26f   :  { %4903 = vmatprep.subr.msk.mxu1 %vm73_vm1, %v5488_v43 }
 0x271   :  { %v3719_v11 = vpop.permute.xlu0 %3718  ;;  %4902 = vmatmul.mubr.msk.f32.vlgmr.msra.gmra.mrb[2].mxu1 %vm69_vm2, %v37_v37  ;;  %v3717_v40 = vpop.permute.xlu1 %3716 }
 0x272   :  { %4904 = vmatpush1.msk.msra.mxu1 %vm73_vm1, %v5480_v42  ;;  %3686 = vmatprep.mubr.f32.mxu1 %v5088_v5  ;;  %v3723_v43 = vsel %vm1336_vm6, %v3715_v38, %v3717_v40  ;;  %v38_v42 = vld [vmem:[%s5731_s3 + $0x14] sm:$0xf]  ;;  %v3724_v49 = vsel %vm1336_vm6, %v3717_v40, %v3719_v11  ;;  %s5097_s3 = smov [#allocation3]  }
 0x273   :  { %4906 = vmatprep.subr.msk.mxu1 %vm73_vm1, %v3721_v44  ;;  %s4772_s10 = sshll.u32 %s5097_s3, 4  ;;  %s4773_s10 = int_to_ptr.vmem [resolvable:$true] %s4772_s10 }
 0x274   :  { %s5063_s12 = scalar_lea.vmem %s4773_s10, 384  ;;  %p5068_p1 = scmp.lt.s32.totalorder %s4773_s10, %s4773_s10 }
 0x275   :  { %v3973_v41 = vpop.permute.xlu0 %3972  ;;  %4905 = vmatmul.mubr.msk.f32.vlgmr.msra.gmra.mrb[4].mxu1 %vm69_vm2, %v37_v37  ;;  %v3971_v45 = vpop.permute.xlu1 %3970  ;;  %p5064_p0 = scmp.ne.s32.totalorder %s4773_s10, %s5063_s12  ;;  %p5069_p2 = scmp.lt.s32.totalorder %s5063_s12, %s5063_s12 }
 0x276   :  { %4907 = vmatpush1.msk.msra.mxu1 %vm73_vm1, %v3720_v27  ;;  %3804 = vmatprep.mubr.f32.mxu1 %v5088_v5  ;;  %v3981_v52 = vsel %vm1597_vm7, %v3971_v45, %v3973_v41 }
 0x277   :  { %4909 = vmatprep.subr.msk.mxu1 %vm73_vm1, %v3723_v43  ;;  %p5070_p3 = por %p5069_p2, %p5068_p1 }
 0x279   :  { %v3975_v47 = vpop.permute.xlu0 %3974  ;;  %4908 = vmatmul.mubr.msk.f32.vlgmr.msra.gmra.mrb[0].mxu1 %vm69_vm2, %v38_v42  ;;  %v3969_v48 = vpop.permute.xlu1 %3968  ;;  %p5071_p4 = pnand %p5070_p3, %p5064_p0 }
 0x27a   :  { %4910 = vmatpush1.msk.msra.mxu1 %vm73_vm1, %v3722_v46  ;;  %3875 = vmatprep.mubr.f32.mxu1 %v5088_v5  ;;  %v3980_v53 = vsel %vm1597_vm7, %v3969_v48, %v3971_v45  ;;  %v3982_v58 = vsel %vm1597_vm7, %v3973_v41, %v3975_v47 }
 0x27b   :  { %4912 = vmatprep.subr.msk.mxu1 %vm73_vm1, %v3719_v11 }
 0x27d   :  { %v3979_v50 = vpop.permute.xlu0 %3978  ;;  %4911 = vmatmul.mubr.msk.f32.vlgmr.msra.gmra.mrb[2].mxu1 %vm69_vm2, %v38_v42  ;;  %v3977_v51 = vpop.permute.xlu1 %3976 }
 0x27e   :  { %4913 = vmatpush1.msk.msra.mxu1 %vm73_vm1, %v3724_v49  ;;  %3946 = vmatprep.mubr.f32.mxu1 %v5088_v5  ;;  %v3983_v56 = vsel %vm1597_vm7, %v3975_v47, %v3977_v51  ;;  %v3984_v61 = vsel %vm1597_vm7, %v3977_v51, %v3979_v50 }
 0x27f   :  { %4915 = vmatprep.subr.msk.mxu1 %vm73_vm1, %v3981_v52 }
 0x281   :  { %v4233_v54 = vpop.permute.xlu0 %4232  ;;  %4914 = vmatmul.mubr.msk.f32.vlgmr.msra.gmra.mrb[4].mxu1 %vm69_vm2, %v38_v42  ;;  %v4231_v55 = vpop.permute.xlu1 %4230 }
 0x282   :  { %4916 = vmatpush1.msk.msra.mxu1 %vm73_vm1, %v3980_v53  ;;  %4064 = vmatprep.mubr.f32.mxu1 %v5088_v5  ;;  %v4241_v63 = vsel %vm1858_vm8, %v4231_v55, %v4233_v54 }
 0x283   :  { %4918 = vmatprep.subr.msk.mxu1 %vm73_vm1, %v3983_v56 }
 0x285   :  { %4917 = vmatmul.mubr.msk.f32.vlgmr.msra.gmra.mrb[0].mxu1 %vm69_vm2, %v39_v57  ;;  %v4229_v59 = vpop.permute.xlu1 %4228  ;;  %v4235_v60 = vpop.permute.xlu0 %4234 }
 0x286   :  { %4919 = vmatpush1.msk.msra.mxu1 %vm73_vm1, %v3982_v58  ;;  %4135 = vmatprep.mubr.f32.mxu1 %v5088_v5  ;;  %v4240_v1 = vsel %vm1858_vm8, %v4229_v59, %v4231_v55  ;;  %v4242_v6 = vsel %vm1858_vm8, %v4233_v54, %v4235_v60 }
 0x287   :  { %4921 = vmatprep.subr.msk.mxu1 %vm73_vm1, %v3979_v50 }
 0x289   :  { %4920 = vmatmul.mubr.msk.f32.vlgmr.msra.gmra.mrb[2].mxu1 %vm69_vm2, %v39_v57  ;;  %v4237_v62 = vpop.permute.xlu1 %4236  ;;  %v4239_v0 = vpop.permute.xlu0 %4238 }
 0x28a   :  { %4922 = vmatpush1.msk.msra.mxu1 %vm73_vm1, %v3984_v61  ;;  %4206 = vmatprep.mubr.f32.mxu1 %v5088_v5  ;;  %v4243_v3 = vsel %vm1858_vm8, %v4235_v60, %v4237_v62  ;;  %v4244_v7 = vsel %vm1858_vm8, %v4237_v62, %v4239_v0 }
 0x28b   :  { %4924 = vmatprep.subr.msk.mxu1 %vm73_vm1, %v4241_v63 }
 0x28d   :  { %4923 = vmatmul.mubr.msk.f32.vlgmr.msra.gmra.mrb[4].mxu1 %vm69_vm2, %v39_v57  ;;  %v4491_v2 = vpop.permute.xlu1 %4490  ;;  %v4493_v14 = vpop.permute.xlu0 %4492 }
 0x28e   :  { %4925 = vmatpush1.msk.msra.mxu1 %vm73_vm1, %v4240_v1  ;;  %4324 = vmatprep.mubr.f32.mxu1 %v5088_v5  ;;  %v4501_v8 = vsel %vm2119_vm9, %v4491_v2, %v4493_v14 }
 0x28f   :  { %4927 = vmatprep.subr.msk.mxu1 %vm73_vm1, %v4243_v3 }
 0x291   :  { %4926 = vmatmul.mubr.msk.f32.vlgmr.msra.gmra.mrb[0].mxu1 %vm69_vm2, %v40_v4  ;;  %v4489_v9 = vpop.permute.xlu1 %4488  ;;  %v4495_v12 = vpop.permute.xlu0 %4494 }
 0x292   :  { %4928 = vmatpush1.msk.msra.mxu1 %vm73_vm1, %v4242_v6  ;;  %4395 = vmatprep.mubr.f32.mxu1 %v5088_v5  ;;  %v4500_v10 = vsel %vm2119_vm9, %v4489_v9, %v4491_v2  ;;  %v4502_v17 = vsel %vm2119_vm9, %v4493_v14, %v4495_v12 }
 0x293   :  { %4930 = vmatprep.subr.msk.mxu1 %vm73_vm1, %v4239_v0 }
 0x295   :  { %4929 = vmatmul.mubr.msk.f32.vlgmr.msra.gmra.mrb[2].mxu1 %vm69_vm2, %v40_v4  ;;  %v4497_v15 = vpop.permute.xlu1 %4496  ;;  %v4499_v18 = vpop.permute.xlu0 %4498 }
 0x296   :  { %4931 = vmatpush1.msk.msra.mxu1 %vm73_vm1, %v4244_v7  ;;  %4466 = vmatprep.mubr.f32.mxu1 %v5088_v5  ;;  %v4503_v16 = vsel %vm2119_vm9, %v4495_v12, %v4497_v15  ;;  %v4504_v19 = vsel %vm2119_vm9, %v4497_v15, %v4499_v18 }
 0x297   :  { %4933 = vmatprep.subr.msk.mxu1 %vm73_vm1, %v4501_v8 }
 0x299   :  { %4932 = vmatmul.mubr.msk.f32.vlgmr.msra.gmra.mrb[4].mxu1 %vm69_vm2, %v40_v4 }
 0x29a   :  { %4934 = vmatpush1.msk.msra.mxu1 %vm73_vm1, %v4500_v10  ;;  %4584 = vmatprep.mubr.f32.mxu1 %v5088_v5 }
 0x29b   :  { %4936 = vmatprep.subr.msk.mxu1 %vm73_vm1, %v4503_v16 }
 0x29d   :  { %4935 = vmatmul.mubr.msk.f32.vlgmr.msra.gmra.mrb[0].mxu1 %vm69_vm2, %v41_v13 }
 0x29e   :  { %4937 = vmatpush1.msk.msra.mxu1 %vm73_vm1, %v4502_v17  ;;  %4655 = vmatprep.mubr.f32.mxu1 %v5088_v5 }
 0x29f   :  { %4939 = vmatprep.subr.msk.mxu1 %vm73_vm1, %v4499_v18 }
 0x2a1   :  { %4938 = vmatmul.mubr.msk.f32.vlgmr.msra.gmra.mrb[2].mxu1 %vm69_vm2, %v41_v13 }
 0x2a2   :  { %4940 = vmatpush1.msk.msra.mxu1 %vm73_vm1, %v4504_v19  ;;  %4726 = vmatprep.mubr.f32.mxu1 %v5088_v5 }
 0x2a5   :  { %4941 = vmatmul.mubr.msk.f32.vlgmr.msra.gmra.mrb[4].mxu1 %vm69_vm2, %v41_v13 }
 0x2a6   :  { %v4743_v20 = vpop.permute.xlu1 %4742 }
 0x370   :  { %v4586_v21 = vpop.f32.mrb[0].mxu1 }
 0x371   :  { %v4745_v22 = vadd.f32 %v4743_v20, %v4586_v21  ;;  %v4588_v23 = vpop.f32.mrb[1].mxu1 }
 0x372   :  { %v4746_v24 = vadd.f32 %v4743_v20, %v4588_v23 }
 0x374   :  { %v4757_v25 = vcombine.low %v4745_v22, %v4746_v24  ;;  %v4657_v26 = vpop.f32.mrb[2].mxu1 }
 0x375   :  { %v4747_v28 = vadd.f32 %v4743_v20, %v4657_v26  ;;  %v4659_v29 = vpop.f32.mrb[3].mxu1 }
 0x376   :  { %4763 = vst [vmem:[#allocation3] sm:$0xff] %v4757_v25  ;;  %v4748_v30 = vadd.f32 %v4743_v20, %v4659_v29 }
 0x378   :  { %v4758_v32 = vcombine.low %v4747_v28, %v4748_v30  ;;  %v4728_v33 = vpop.f32.mrb[4].mxu1 }
 0x379   :  { %v4749_v34 = vadd.f32 %v4743_v20, %v4728_v33  ;;  %v4730_v35 = vpop.f32.mrb[5].mxu1 }
 0x37a   :  { %4764 = vst [vmem:[#allocation3 + $0x8] sm:$0xff] %v4758_v32  ;;  %v4750_v5 = vadd.f32 %v4743_v20, %v4730_v35 }
 0x37c   :  { %v4759_v36 = vcombine.low %v4749_v34, %v4750_v5 }
 0x37e   :  { %4765 = vst.msk [vmem:[#allocation3 + $0x10] sm:$0xff] %vm5441_vm11, %v4759_v36 }
 0x37f   :  { %5074 = shalt.err (!%p5071_p4)
}
 0x380   :  { %s5075_s15 = scalar_lea.hbm %s5734_s6, 384 }
 0x381   :  { %p5076_p5 = scmp.ne.s32.totalorder %s5734_s6, %s5075_s15  ;;  %p5079_p6 = scmp.lt.u32.totalorder %s5075_s15, %s5734_s6 }
 0x383   :  { %p5081_p7 = pnand %p5079_p6, %p5076_p5 }
 0x385   :  { %5084 = shalt.err (!%p5081_p7)
}
 0x386   :  { %4775 = dma.vmem_to_hbm [thread:$0]  %s4773_s10, 384, %s5734_s6, [#allocation4]  }
 0x387   :  { %5085 = dma.done.wait [#allocation4], 384  }
 0x388   :  { %5086 = vsyncadd [#allocation4], 4294966912 }
 0x389   :  { %4779 = vsyncpa [#allocation4], 1 }

</bundles_post_ra>
